<compile_context>
chip_gen: v5e
topology: v5e:2x2
jax: 0.10.0
libtpu: 0.0.40
codegen_flags: <defaults>
</compile_context>

<pallas_src>
import functools

import jax
import jax.numpy as jnp
import numpy as np
from jax import lax
from jax.experimental import pallas as pl
from jax.experimental.pallas import tpu as pltpu


# ----------------------------------------------------------------------------
# Fused kernel: conv1+pool1+relu -> conv2+pool2+relu -> flatten -> fc1/2/3
# ----------------------------------------------------------------------------
def _lenet_fused_kernel(x_ref, t1_ref, b1_ref, t2_ref, b2_ref,
                        wf1_ref, bf1_ref, wf2_ref, bf2_ref,
                        wf3_ref, bf3_ref, o_ref, *, bblk):
    f32 = jnp.float32
    cdt = t1_ref.dtype                 # matmul operand dtype (bf16 by default)

    x = x_ref[...]                     # (bblk, 1024): padded 32x32 rows in lanes

    # ---- Stage 1: conv1(5x5,'same') + avgpool1(2) + ReLU, one MXU matmul ----
    # Row (Y*bblk + b) of s1 holds padded input rows [4Y, 4Y+16) of sample b;
    # lane offsets 128*Y are 128-aligned static slices.  t1 is laid out so the
    # result is directly the conv2 strip LHS:
    #   z[Y*bblk+b, r*84 + x'*6 + c1] = relu(pool1(conv1(x)))[b, 2Y+r, x', c1]
    s1 = jnp.concatenate([x[:, 128 * Y:128 * Y + 512] for Y in range(5)],
                         axis=0).astype(cdt)                        # (5B, 512)
    z = jnp.dot(s1, t1_ref[...], preferred_element_type=f32)        # (5B, 504)
    z = jnp.maximum(z + b1_ref[...], 0.0)

    # ---- Stage 2: conv2(5x5,valid) + avgpool2(2) + ReLU, one K=504 matmul ---
    c = jnp.dot(z.astype(cdt), t2_ref[...], preferred_element_type=f32)
    c = jnp.maximum(c + b2_ref[...], 0.0)                           # (5B, 80)

    # ---- Flatten to per-sample (Y, X, c2) order: gather the 5 Y-blocks into
    #      lanes -> (B, 400).  fc1 weights are pre-permuted to match. ---------
    h = jnp.concatenate([c[Y * bblk:(Y + 1) * bblk, :] for Y in range(5)],
                        axis=1).astype(cdt)                          # (B, 400)

    # ---- fc1 -> fc2 -> fc3 (no ReLUs between FC layers in the module) -------
    h = jnp.dot(h, wf1_ref[...], preferred_element_type=f32) + bf1_ref[...]
    h = jnp.dot(h.astype(cdt), wf2_ref[...],
                preferred_element_type=f32) + bf2_ref[...]
    h = jnp.dot(h.astype(cdt), wf3_ref[...],
                preferred_element_type=f32) + bf3_ref[...]

    # Single lane-dense full-block store (num_classes zero-padded to 128 lanes).
    o_ref[...] = h.astype(o_ref.dtype)


# ----------------------------------------------------------------------------
# One-time parameter repacking (host side, numpy)
# ----------------------------------------------------------------------------
def _fold_avgpool2_into_conv(w):
    """(Co,Ci,5,5) -> (Co,Ci,6,6): avgpool2(conv5x5(x)) == conv6x6_stride2(x)."""
    w = np.asarray(w, np.float32)
    out = np.zeros(w.shape[:2] + (6, 6), np.float32)
    for dy in (0, 1):
        for dx in (0, 1):
            out[:, :, dy:dy + 5, dx:dx + 5] += w
    return 0.25 * out


def _build_t1(v1):
    """v1 (6,1,6,6) -> T1 (512, 504).

    LHS row = one 16x32 padded-row window (rows [4Y,4Y+16)) flattened
    (yloc*32 + xi).  Output col = r*84 + x'*6 + c1, i.e. stage-1 output row
    2Y+r, pooled column x', channel c1 -- exactly the conv2 strip layout."""
    t1 = np.zeros((512, 504), np.float32)
    for r in range(6):
        for xq in range(14):
            for ci in range(6):
                col = r * 84 + xq * 6 + ci
                for rp in range(6):
                    yloc = 2 * r + rp
                    for t in range(6):
                        xi = 2 * xq + t
                        t1[yloc * 32 + xi, col] = v1[ci, 0, rp, t]
    return t1


def _build_t2(v2):
    """v2 (16,6,6,6) -> T2 (504, 80):
    T2[r*84 + x'*6 + c1, X*16 + c2] = v2[c2, c1, r, x' - 2X]."""
    t2 = np.zeros((504, 80), np.float32)
    for X in range(5):
        for co in range(16):
            col = X * 16 + co
            for r in range(6):
                for t in range(6):
                    xq = 2 * X + t
                    for ci in range(6):
                        t2[r * 84 + xq * 6 + ci, col] = v2[co, ci, r, t]
    return t2


def prepare_params(p, compute_dtype=jnp.bfloat16):
    """Repack PyTorch-layout parameters into the fused-kernel operand set."""
    b1 = np.asarray(p["b1"], np.float32)
    b2 = np.asarray(p["b2"], np.float32)
    wf1 = np.asarray(p["wf1"], np.float32)
    wf2 = np.asarray(p["wf2"], np.float32)
    wf3 = np.asarray(p["wf3"], np.float32)
    bf1 = np.asarray(p["bf1"], np.float32)
    bf2 = np.asarray(p["bf2"], np.float32)
    bf3 = np.asarray(p["bf3"], np.float32)
    num_classes = wf3.shape[0]
    out_lanes = max(128, ((num_classes + 127) // 128) * 128)

    v1 = _fold_avgpool2_into_conv(p["w1"])      # (6,1,6,6)
    v2 = _fold_avgpool2_into_conv(p["w2"])      # (16,6,6,6)

    # fc1 expects PyTorch flatten order (c2, Y, X); the kernel flattens as
    # (Y, X, c2) -> permute the fc1 input dimension accordingly.
    wf1p = (wf1.reshape(120, 16, 5, 5).transpose(0, 2, 3, 1)
            .reshape(120, 400).T)                                   # (400, 120)
    # fc3 padded to a lane-dense 128-wide output.
    wf3p = np.zeros((84, out_lanes), np.float32)
    wf3p[:, :num_classes] = wf3.T
    bf3p = np.zeros((1, out_lanes), np.float32)
    bf3p[0, :num_classes] = bf3

    cd = compute_dtype
    return dict(
        t1=jnp.asarray(_build_t1(v1), cd),
        b1=jnp.asarray(np.tile(b1, 84).reshape(1, 504), jnp.float32),
        t2=jnp.asarray(_build_t2(v2), cd),
        b2=jnp.asarray(np.tile(b2, 5).reshape(1, 80), jnp.float32),
        wf1=jnp.asarray(wf1p, cd),
        bf1=jnp.asarray(bf1.reshape(1, 120), jnp.float32),
        wf2=jnp.asarray(wf2.T, cd),
        bf2=jnp.asarray(bf2.reshape(1, 84), jnp.float32),
        wf3=jnp.asarray(wf3p, cd),
        bf3=jnp.asarray(bf3p, jnp.float32),
    )


# ----------------------------------------------------------------------------
# Wrapper: minimal preprocessing + one pallas_call (batch grid)
# ----------------------------------------------------------------------------
def _pick_batch_block(batch):
    # Single grid step for small batches (per-step overhead dominates there);
    # >=2 parallel steps at larger batches so v7x's second TensorCore is used.
    if batch <= 16:
        return batch
    for cand in (512, 256, 128, 64, 32, 16, 8):
        if batch % cand == 0 and batch // cand >= 2:
            return cand
    return batch


@functools.partial(jax.jit, static_argnames=("num_classes",))
def lenet_forward(x, prep, *, num_classes):
    """Fused LeNet forward: x (B, 1, 28, 28) -> logits (B, num_classes)."""
    B = x.shape[0]
    out_lanes = prep["wf3"].shape[1]

    # Cheap, non-inflating prep: zero-pad 28->32 (conv1 'same' + strip
    # geometry) and flatten rows into lanes so every in-kernel window is a
    # 128-aligned static lane slice.
    xp = jnp.pad(x[:, 0].astype(jnp.float32), ((0, 0), (2, 2), (2, 2)))
    x_flat = xp.reshape(B, 1024)

    bblk = _pick_batch_block(B)
    grid = (B // bblk,)
    const = lambda i: (0, 0)

    weight_keys = ("t1", "b1", "t2", "b2", "wf1", "bf1", "wf2", "bf2",
                   "wf3", "bf3")
    w_bytes = sum(int(np.prod(prep[k].shape)) * prep[k].dtype.itemsize
                  for k in weight_keys)
    cost = pl.CostEstimate(
        flops=2 * B * (5 * 512 * 504 + 5 * 504 * 80 + 400 * 120 + 120 * 84
                       + 84 * out_lanes),
        transcendentals=0,
        bytes_accessed=int(B * 1024 * 4 + w_bytes + B * out_lanes * 4),
    )

    out_padded = pl.pallas_call(
        functools.partial(_lenet_fused_kernel, bblk=bblk),
        out_shape=jax.ShapeDtypeStruct((B, out_lanes), jnp.float32),
        grid=grid,
        in_specs=[
            pl.BlockSpec((bblk, 1024), lambda i: (i, 0)),   # padded images
            pl.BlockSpec((512, 504), const),                # t1 (conv1 Toeplitz)
            pl.BlockSpec((1, 504), const),                  # b1 (tiled)
            pl.BlockSpec((504, 80), const),                 # t2 (conv2 Toeplitz)
            pl.BlockSpec((1, 80), const),                   # b2 (tiled)
            pl.BlockSpec((400, 120), const),                # fc1 (permuted)
            pl.BlockSpec((1, 120), const),                  # bf1
            pl.BlockSpec((120, 84), const),                 # fc2
            pl.BlockSpec((1, 84), const),                   # bf2
            pl.BlockSpec((84, out_lanes), const),           # fc3 (lane-padded)
            pl.BlockSpec((1, out_lanes), const),            # bf3 (lane-padded)
        ],
        out_specs=pl.BlockSpec((bblk, out_lanes), lambda i: (i, 0)),
        compiler_params=pltpu.CompilerParams(
            dimension_semantics=("parallel",)),
        cost_estimate=cost,
    )(x_flat, prep["t1"], prep["b1"], prep["t2"], prep["b2"],
      prep["wf1"], prep["bf1"], prep["wf2"], prep["bf2"],
      prep["wf3"], prep["bf3"])

    return out_padded[:, :num_classes]


# ----------------------------------------------------------------------------
# Deterministic parameter init (PyTorch-style uniform bounds, synthetic)
# ----------------------------------------------------------------------------
def init_params(key, num_classes):
    def uni(k, shape, fan_in):
        bound = 1.0 / float(np.sqrt(fan_in))
        return jax.random.uniform(k, shape, jnp.float32, -bound, bound)

    ks = jax.random.split(key, 10)
    return dict(
        w1=uni(ks[0], (6, 1, 5, 5), 25),    b1=uni(ks[1], (6,), 25),
        w2=uni(ks[2], (16, 6, 5, 5), 150),  b2=uni(ks[3], (16,), 150),
        wf1=uni(ks[4], (120, 400), 400),    bf1=uni(ks[5], (120,), 400),
        wf2=uni(ks[6], (84, 120), 120),     bf2=uni(ks[7], (84,), 120),
        wf3=uni(ks[8], (num_classes, 84), 84),
        bf3=uni(ks[9], (num_classes,), 84),
    )


# ----------------------------------------------------------------------------
# Pure-JAX reference (matches the PyTorch module exactly)
# ----------------------------------------------------------------------------
def _ref_pool(x):
    B, C, H, W = x.shape
    return x.reshape(B, C, H // 2, 2, W // 2, 2).mean(axis=(3, 5))


def ref_forward(x, p):
    dn = ("NCHW", "OIHW", "NCHW")
    y = lax.conv_general_dilated(x, p["w1"], (1, 1), [(2, 2), (2, 2)],
                                 dimension_numbers=dn)
    y = y + p["b1"][None, :, None, None]
    y = jnp.maximum(_ref_pool(y), 0.0)
    y = lax.conv_general_dilated(y, p["w2"], (1, 1), "VALID",
                                 dimension_numbers=dn)
    y = y + p["b2"][None, :, None, None]
    y = jnp.maximum(_ref_pool(y), 0.0)
    y = y.reshape(y.shape[0], -1)
    y = y @ p["wf1"].T + p["bf1"]
    y = y @ p["wf2"].T + p["bf2"]
    y = y @ p["wf3"].T + p["bf3"]
    return y


if __name__ == "__main__":
    num_classes = 10
    key = jax.random.PRNGKey(0)
    kx, kp = jax.random.split(key)
    # LeNet geometry requires 28x28 single-channel input (flatten -> 16*5*5=400).
    x = jax.random.normal(kx, (2, 1, 28, 28), jnp.float32)
    params = init_params(kp, num_classes)
    ref = ref_forward(x, params)

    # Exact-math check (f32 matmul operands): validates Toeplitz/permutation math.
    prep_f32 = prepare_params(params, compute_dtype=jnp.float32)
    out_f32 = jax.block_until_ready(lenet_forward(x, prep_f32,
                                                  num_classes=num_classes))
    assert out_f32.shape == (2, num_classes)
    np.testing.assert_allclose(np.asarray(out_f32), np.asarray(ref),
                               rtol=5e-4, atol=5e-4)

    # Performance configuration: bf16 MXU operands, f32 accumulation/elementwise.
    prep_bf16 = prepare_params(params, compute_dtype=jnp.bfloat16)
    out_bf16 = jax.block_until_ready(lenet_forward(x, prep_bf16,
                                                   num_classes=num_classes))
    assert out_bf16.shape == (2, num_classes)
    np.testing.assert_allclose(np.asarray(out_bf16), np.asarray(ref),
                               rtol=5e-2, atol=1.5e-2)

    print("KERNEL_OK")
</pallas_src>

<mosaic_0001>
module attributes {stable_mosaic.version = 11 : i64} {
  func.func @_lenet_fused_kernel(%arg0: i32, %arg1: memref<2x1024xf32, #tpu.memory_space<vmem>>, %arg2: memref<512x504xf32, #tpu.memory_space<vmem>>, %arg3: memref<1x504xf32, #tpu.memory_space<vmem>>, %arg4: memref<504x80xf32, #tpu.memory_space<vmem>>, %arg5: memref<1x80xf32, #tpu.memory_space<vmem>>, %arg6: memref<400x120xf32, #tpu.memory_space<vmem>>, %arg7: memref<1x120xf32, #tpu.memory_space<vmem>>, %arg8: memref<120x84xf32, #tpu.memory_space<vmem>>, %arg9: memref<1x84xf32, #tpu.memory_space<vmem>>, %arg10: memref<84x128xf32, #tpu.memory_space<vmem>>, %arg11: memref<1x128xf32, #tpu.memory_space<vmem>>, %arg12: memref<2x128xf32, #tpu.memory_space<vmem>>) attributes {dimension_semantics = [#tpu.dimension_semantics<parallel>], iteration_bounds = array<i64: 1>, scalar_prefetch = 0 : i64, scratch_operands = 0 : i64, tpu.core_type = #tpu.core_type<tc>, window_params = [{transform_indices = @transform_0, window_bounds = array<i64: 2, 1024>}, {pipeline_mode = #tpu.pipeline_mode<synchronous>, transform_indices = @transform_1, window_bounds = array<i64: 512, 504>}, {pipeline_mode = #tpu.pipeline_mode<synchronous>, transform_indices = @transform_2, window_bounds = array<i64: 1, 504>}, {pipeline_mode = #tpu.pipeline_mode<synchronous>, transform_indices = @transform_3, window_bounds = array<i64: 504, 80>}, {pipeline_mode = #tpu.pipeline_mode<synchronous>, transform_indices = @transform_4, window_bounds = array<i64: 1, 80>}, {pipeline_mode = #tpu.pipeline_mode<synchronous>, transform_indices = @transform_5, window_bounds = array<i64: 400, 120>}, {pipeline_mode = #tpu.pipeline_mode<synchronous>, transform_indices = @transform_6, window_bounds = array<i64: 1, 120>}, {pipeline_mode = #tpu.pipeline_mode<synchronous>, transform_indices = @transform_7, window_bounds = array<i64: 120, 84>}, {pipeline_mode = #tpu.pipeline_mode<synchronous>, transform_indices = @transform_8, window_bounds = array<i64: 1, 84>}, {pipeline_mode = #tpu.pipeline_mode<synchronous>, transform_indices = @transform_9, window_bounds = array<i64: 84, 128>}, {pipeline_mode = #tpu.pipeline_mode<synchronous>, transform_indices = @transform_10, window_bounds = array<i64: 1, 128>}, {transform_indices = @transform_11, window_bounds = array<i64: 2, 128>}]} {
    %c0 = arith.constant 0 : index
    %c0_0 = arith.constant 0 : index
    %0 = vector.load %arg1[%c0, %c0_0] : memref<2x1024xf32, #tpu.memory_space<vmem>>, vector<2x1024xf32>
    %1 = vector.extract_strided_slice %0 {offsets = [0, 0], sizes = [2, 512], strides = [1, 1]} : vector<2x1024xf32> to vector<2x512xf32>
    %2 = vector.extract_strided_slice %0 {offsets = [0, 128], sizes = [2, 512], strides = [1, 1]} : vector<2x1024xf32> to vector<2x512xf32>
    %3 = vector.extract_strided_slice %0 {offsets = [0, 256], sizes = [2, 512], strides = [1, 1]} : vector<2x1024xf32> to vector<2x512xf32>
    %4 = vector.extract_strided_slice %0 {offsets = [0, 384], sizes = [2, 512], strides = [1, 1]} : vector<2x1024xf32> to vector<2x512xf32>
    %5 = vector.extract_strided_slice %0 {offsets = [0, 512], sizes = [2, 512], strides = [1, 1]} : vector<2x1024xf32> to vector<2x512xf32>
    %6 = tpu.concatenate %1, %2, %3, %4, %5 in 0 : vector<2x512xf32>, vector<2x512xf32>, vector<2x512xf32>, vector<2x512xf32>, vector<2x512xf32> -> vector<10x512xf32>
    %c0_1 = arith.constant 0 : index
    %c0_2 = arith.constant 0 : index
    %7 = vector.load %arg2[%c0_1, %c0_2] : memref<512x504xf32, #tpu.memory_space<vmem>>, vector<512x504xf32>
    %cst = arith.constant dense<0.000000e+00> : vector<10x504xf32>
    %8 = tpu.matmul %6, %7, %cst {dimension_numbers = #tpu.dot_dimension_numbers<[1], [0], [0], [1], [0, 0, 1, 1], [], []>} : vector<10x512xf32>, vector<512x504xf32>, vector<10x504xf32> -> vector<10x504xf32>
    %c0_3 = arith.constant 0 : index
    %c0_4 = arith.constant 0 : index
    %9 = vector.load %arg3[%c0_3, %c0_4] : memref<1x504xf32, #tpu.memory_space<vmem>>, vector<1x504xf32>
    %10 = vector.broadcast %9 : vector<1x504xf32> to vector<10x504xf32>
    %11 = arith.addf %8, %10 : vector<10x504xf32>
    %cst_5 = arith.constant 0.000000e+00 : f32
    %12 = vector.broadcast %cst_5 : f32 to vector<10x504xf32>
    %13 = arith.maximumf %11, %12 : vector<10x504xf32>
    %c0_6 = arith.constant 0 : index
    %c0_7 = arith.constant 0 : index
    %14 = vector.load %arg4[%c0_6, %c0_7] : memref<504x80xf32, #tpu.memory_space<vmem>>, vector<504x80xf32>
    %cst_8 = arith.constant dense<0.000000e+00> : vector<10x80xf32>
    %15 = tpu.matmul %13, %14, %cst_8 {dimension_numbers = #tpu.dot_dimension_numbers<[1], [0], [0], [1], [0, 0, 1, 1], [], []>} : vector<10x504xf32>, vector<504x80xf32>, vector<10x80xf32> -> vector<10x80xf32>
    %c0_9 = arith.constant 0 : index
    %c0_10 = arith.constant 0 : index
    %16 = vector.load %arg5[%c0_9, %c0_10] : memref<1x80xf32, #tpu.memory_space<vmem>>, vector<1x80xf32>
    %17 = vector.broadcast %16 : vector<1x80xf32> to vector<10x80xf32>
    %18 = arith.addf %15, %17 : vector<10x80xf32>
    %cst_11 = arith.constant 0.000000e+00 : f32
    %19 = vector.broadcast %cst_11 : f32 to vector<10x80xf32>
    %20 = arith.maximumf %18, %19 : vector<10x80xf32>
    %21 = vector.extract_strided_slice %20 {offsets = [0, 0], sizes = [2, 80], strides = [1, 1]} : vector<10x80xf32> to vector<2x80xf32>
    %22 = vector.extract_strided_slice %20 {offsets = [2, 0], sizes = [2, 80], strides = [1, 1]} : vector<10x80xf32> to vector<2x80xf32>
    %23 = vector.extract_strided_slice %20 {offsets = [4, 0], sizes = [2, 80], strides = [1, 1]} : vector<10x80xf32> to vector<2x80xf32>
    %24 = vector.extract_strided_slice %20 {offsets = [6, 0], sizes = [2, 80], strides = [1, 1]} : vector<10x80xf32> to vector<2x80xf32>
    %25 = vector.extract_strided_slice %20 {offsets = [8, 0], sizes = [2, 80], strides = [1, 1]} : vector<10x80xf32> to vector<2x80xf32>
    %26 = tpu.concatenate %21, %22, %23, %24, %25 in 1 : vector<2x80xf32>, vector<2x80xf32>, vector<2x80xf32>, vector<2x80xf32>, vector<2x80xf32> -> vector<2x400xf32>
    %c0_12 = arith.constant 0 : index
    %c0_13 = arith.constant 0 : index
    %27 = vector.load %arg6[%c0_12, %c0_13] : memref<400x120xf32, #tpu.memory_space<vmem>>, vector<400x120xf32>
    %cst_14 = arith.constant dense<0.000000e+00> : vector<2x120xf32>
    %28 = tpu.matmul %26, %27, %cst_14 {dimension_numbers = #tpu.dot_dimension_numbers<[1], [0], [0], [1], [0, 0, 1, 1], [], []>} : vector<2x400xf32>, vector<400x120xf32>, vector<2x120xf32> -> vector<2x120xf32>
    %c0_15 = arith.constant 0 : index
    %c0_16 = arith.constant 0 : index
    %29 = vector.load %arg7[%c0_15, %c0_16] : memref<1x120xf32, #tpu.memory_space<vmem>>, vector<1x120xf32>
    %30 = vector.broadcast %29 : vector<1x120xf32> to vector<2x120xf32>
    %31 = arith.addf %28, %30 : vector<2x120xf32>
    %c0_17 = arith.constant 0 : index
    %c0_18 = arith.constant 0 : index
    %32 = vector.load %arg8[%c0_17, %c0_18] : memref<120x84xf32, #tpu.memory_space<vmem>>, vector<120x84xf32>
    %cst_19 = arith.constant dense<0.000000e+00> : vector<2x84xf32>
    %33 = tpu.matmul %31, %32, %cst_19 {dimension_numbers = #tpu.dot_dimension_numbers<[1], [0], [0], [1], [0, 0, 1, 1], [], []>} : vector<2x120xf32>, vector<120x84xf32>, vector<2x84xf32> -> vector<2x84xf32>
    %c0_20 = arith.constant 0 : index
    %c0_21 = arith.constant 0 : index
    %34 = vector.load %arg9[%c0_20, %c0_21] : memref<1x84xf32, #tpu.memory_space<vmem>>, vector<1x84xf32>
    %35 = vector.broadcast %34 : vector<1x84xf32> to vector<2x84xf32>
    %36 = arith.addf %33, %35 : vector<2x84xf32>
    %c0_22 = arith.constant 0 : index
    %c0_23 = arith.constant 0 : index
    %37 = vector.load %arg10[%c0_22, %c0_23] : memref<84x128xf32, #tpu.memory_space<vmem>>, vector<84x128xf32>
    %cst_24 = arith.constant dense<0.000000e+00> : vector<2x128xf32>
    %38 = tpu.matmul %36, %37, %cst_24 {dimension_numbers = #tpu.dot_dimension_numbers<[1], [0], [0], [1], [0, 0, 1, 1], [], []>} : vector<2x84xf32>, vector<84x128xf32>, vector<2x128xf32> -> vector<2x128xf32>
    %c0_25 = arith.constant 0 : index
    %c0_26 = arith.constant 0 : index
    %39 = vector.load %arg11[%c0_25, %c0_26] : memref<1x128xf32, #tpu.memory_space<vmem>>, vector<1x128xf32>
    %40 = vector.broadcast %39 : vector<1x128xf32> to vector<2x128xf32>
    %41 = arith.addf %38, %40 : vector<2x128xf32>
    %c0_27 = arith.constant 0 : index
    %c0_28 = arith.constant 0 : index
    %42 = vector.load %arg12[%c0_27, %c0_28] : memref<2x128xf32, #tpu.memory_space<vmem>>, vector<2x128xf32>
    tpu.vector_store %arg12[%c0_27, %c0_28], %41 {strides = array<i32>} : memref<2x128xf32, #tpu.memory_space<vmem>>, vector<2x128xf32>,
    return
  }
  func.func @transform_0(%arg0: i32) -> (i32, i32) {
    %c0_i32 = arith.constant 0 : i32
    %c0_i32_0 = arith.constant 0 : i32
    return %arg0, %c0_i32 : i32, i32
  }
  func.func @transform_1(%arg0: i32) -> (i32, i32) {
    %c0_i32 = arith.constant 0 : i32
    %c0_i32_0 = arith.constant 0 : i32
    %c0_i32_1 = arith.constant 0 : i32
    return %c0_i32, %c0_i32_0 : i32, i32
  }
  func.func @transform_2(%arg0: i32) -> (i32, i32) {
    %c0_i32 = arith.constant 0 : i32
    %c0_i32_0 = arith.constant 0 : i32
    %c0_i32_1 = arith.constant 0 : i32
    return %c0_i32, %c0_i32_0 : i32, i32
  }
  func.func @transform_3(%arg0: i32) -> (i32, i32) {
    %c0_i32 = arith.constant 0 : i32
    %c0_i32_0 = arith.constant 0 : i32
    %c0_i32_1 = arith.constant 0 : i32
    return %c0_i32, %c0_i32_0 : i32, i32
  }
  func.func @transform_4(%arg0: i32) -> (i32, i32) {
    %c0_i32 = arith.constant 0 : i32
    %c0_i32_0 = arith.constant 0 : i32
    %c0_i32_1 = arith.constant 0 : i32
    return %c0_i32, %c0_i32_0 : i32, i32
  }
  func.func @transform_5(%arg0: i32) -> (i32, i32) {
    %c0_i32 = arith.constant 0 : i32
    %c0_i32_0 = arith.constant 0 : i32
    %c0_i32_1 = arith.constant 0 : i32
    return %c0_i32, %c0_i32_0 : i32, i32
  }
  func.func @transform_6(%arg0: i32) -> (i32, i32) {
    %c0_i32 = arith.constant 0 : i32
    %c0_i32_0 = arith.constant 0 : i32
    %c0_i32_1 = arith.constant 0 : i32
    return %c0_i32, %c0_i32_0 : i32, i32
  }
  func.func @transform_7(%arg0: i32) -> (i32, i32) {
    %c0_i32 = arith.constant 0 : i32
    %c0_i32_0 = arith.constant 0 : i32
    %c0_i32_1 = arith.constant 0 : i32
    return %c0_i32, %c0_i32_0 : i32, i32
  }
  func.func @transform_8(%arg0: i32) -> (i32, i32) {
    %c0_i32 = arith.constant 0 : i32
    %c0_i32_0 = arith.constant 0 : i32
    %c0_i32_1 = arith.constant 0 : i32
    return %c0_i32, %c0_i32_0 : i32, i32
  }
  func.func @transform_9(%arg0: i32) -> (i32, i32) {
    %c0_i32 = arith.constant 0 : i32
    %c0_i32_0 = arith.constant 0 : i32
    %c0_i32_1 = arith.constant 0 : i32
    return %c0_i32, %c0_i32_0 : i32, i32
  }
  func.func @transform_10(%arg0: i32) -> (i32, i32) {
    %c0_i32 = arith.constant 0 : i32
    %c0_i32_0 = arith.constant 0 : i32
    %c0_i32_1 = arith.constant 0 : i32
    return %c0_i32, %c0_i32_0 : i32, i32
  }
  func.func @transform_11(%arg0: i32) -> (i32, i32) {
    %c0_i32 = arith.constant 0 : i32
    %c0_i32_0 = arith.constant 0 : i32
    return %arg0, %c0_i32 : i32, i32
  }
}

</mosaic_0001>

<bundles_post_ra>
// kernel: lenet_forward.1
= control target key start
LH: loop header
LB: loop body
LE: loop exit
PB: predicated region body
PF: predicated region fallthrough
CT: control target
= control target key end

     0   :  { %s2597_s0 = inlined_call_operand.vmem [shape: f32[2,1024], index: 0, kind: input, shape index: {}]   ;;  %s2598_s1 = inlined_call_operand.vmem [shape: f32[512,504], index: 1, kind: input, shape index: {}]   ;;  %s2599_s2 = inlined_call_operand.vmem [shape: f32[1,504], index: 2, kind: input, shape index: {}]   ;;  %s2600_s3 = inlined_call_operand.vmem [shape: f32[504,80], index: 3, kind: input, shape index: {}]   ;;  %s2601_s4 = inlined_call_operand.vmem [shape: f32[1,80], index: 4, kind: input, shape index: {}]   ;;  %s2602_s5 = inlined_call_operand.vmem [shape: f32[400,120], index: 5, kind: input, shape index: {}]   ;;  %s2603_s6 = inlined_call_operand.vmem [shape: f32[1,120], index: 6, kind: input, shape index: {}]   ;;  %s2604_s7 = inlined_call_operand.vmem [shape: f32[120,84], index: 7, kind: input, shape index: {}]   ;;  %s2605_s8 = inlined_call_operand.vmem [shape: f32[1,84], index: 8, kind: input, shape index: {}]   ;;  %s2606_s9 = inlined_call_operand.vmem [shape: f32[84,128], index: 9, kind: input, shape index: {}]   ;;  %s2607_s10 = inlined_call_operand.vmem [shape: f32[1,128], index: 10, kind: input, shape index: {}]   ;;  %s2608_s11 = inlined_call_operand.hbm [shape: f32[2,128], index: 11, kind: output, shape index: {}]  }
   0x1   :  { %v300_v0 = vld [vmem:[%s2598_s1 + $0x5e0] sm:$0xff]  ;;  %v301_v61 = vld [vmem:[%s2598_s1 + $0x5e8] sm:$0xff] }
   0x2   :  { %v172_v1 = vld [vmem:[%s2598_s1 + $0x1e0] sm:$0xff]  ;;  %424 = vmatpush.msra.mxu2 %v300_v0  ;;  %v173_v0 = vld [vmem:[%s2598_s1 + $0x1e8] sm:$0xff] }
   0x3   :  { %v296_v2 = vld [vmem:[%s2598_s1 + $0x5c0] sm:$0xff]  ;;  %378 = vmatpush.msra.mxu0 %v172_v1  ;;  %v297_v1 = vld [vmem:[%s2598_s1 + $0x5c8] sm:$0xff] }
   0x4   :  { %v364_v3 = vld [vmem:[%s2598_s1 + $0x7e0] sm:$0xff]  ;;  %425 = vmatpush.msra.mxu2 %v296_v2  ;;  %v365_v2 = vld [vmem:[%s2598_s1 + $0x7e8] sm:$0xff] }
   0x5   :  { %v168_v4 = vld [vmem:[%s2598_s1 + $0x1c0] sm:$0xff]  ;;  %447 = vmatpush.msra.mxu3 %v364_v3 }
   0x6   :  { %v236_v5 = vld [vmem:[%s2598_s1 + $0x3e0] sm:$0xff]  ;;  %379 = vmatpush.msra.mxu0 %v168_v4  ;;  %v169_v4 = vld [vmem:[%s2598_s1 + $0x1c8] sm:$0xff] }
   0x7   :  { %401 = vmatpush.msra.mxu1 %v236_v5  ;;  %v292_v6 = vld [vmem:[%s2598_s1 + $0x5a0] sm:$0xff]  ;;  %v237_v5 = vld [vmem:[%s2598_s1 + $0x3e8] sm:$0xff] }
   0x8   :  { %v360_v7 = vld [vmem:[%s2598_s1 + $0x7c0] sm:$0xff]  ;;  %426 = vmatpush.msra.mxu2 %v292_v6  ;;  %v293_v6 = vld [vmem:[%s2598_s1 + $0x5a8] sm:$0xff] }
   0x9   :  { %v164_v8 = vld [vmem:[%s2598_s1 + $0x1a0] sm:$0xff]  ;;  %448 = vmatpush.msra.mxu3 %v360_v7  ;;  %v361_v7 = vld [vmem:[%s2598_s1 + $0x7c8] sm:$0xff] }
   0xa   :  { %v232_v9 = vld [vmem:[%s2598_s1 + $0x3c0] sm:$0xff]  ;;  %380 = vmatpush.msra.mxu0 %v164_v8  ;;  %v165_v8 = vld [vmem:[%s2598_s1 + $0x1a8] sm:$0xff] }
   0xb   :  { %v356_v10 = vld [vmem:[%s2598_s1 + $0x7a0] sm:$0xff]  ;;  %402 = vmatpush.msra.mxu1 %v232_v9 }
   0xc   :  { %v288_v11 = vld [vmem:[%s2598_s1 + $0x580] sm:$0xff]  ;;  %449 = vmatpush.msra.mxu3 %v356_v10  ;;  %v1518_v10 = vld [vmem:[%s2597_s0 + $0x8] sm:$0xff] }
   0xd   :  { %v160_v12 = vld [vmem:[%s2598_s1 + $0x180] sm:$0xff]  ;;  %427 = vmatpush.msra.mxu2 %v288_v11  ;;  %v233_v11 = vld [vmem:[%s2598_s1 + $0x3c8] sm:$0xff]  ;;  %55 = vst [vmem:[#allocation1 + $0x21] ss:$4 sm:$0xff] %v1518_v10 }
   0xe   :  { %v228_v13 = vld [vmem:[%s2598_s1 + $0x3a0] sm:$0xff]  ;;  %381 = vmatpush.msra.mxu0 %v160_v12  ;;  %v289_v12 = vld [vmem:[%s2598_s1 + $0x588] sm:$0xff] }
   0xf   :  { %v352_v14 = vld [vmem:[%s2598_s1 + $0x780] sm:$0xff]  ;;  %403 = vmatpush.msra.mxu1 %v228_v13  ;;  %v357_v13 = vld [vmem:[%s2598_s1 + $0x7a8] sm:$0xff] }
  0x10   :  { %v224_v15 = vld [vmem:[%s2598_s1 + $0x380] sm:$0xff]  ;;  %450 = vmatpush.msra.mxu3 %v352_v14 }
  0x11   :  { %v284_v16 = vld [vmem:[%s2598_s1 + $0x560] sm:$0xff]  ;;  %404 = vmatpush.msra.mxu1 %v224_v15 }
  0x12   :  { %v156_v17 = vld [vmem:[%s2598_s1 + $0x160] sm:$0xff]  ;;  %428 = vmatpush.msra.mxu2 %v284_v16 }
  0x13   :  { %v348_v18 = vld [vmem:[%s2598_s1 + $0x760] sm:$0xff]  ;;  %382 = vmatpush.msra.mxu0 %v156_v17 }
  0x14   :  { %v220_v19 = vld [vmem:[%s2598_s1 + $0x360] sm:$0xff]  ;;  %451 = vmatpush.msra.mxu3 %v348_v18 }
  0x15   :  { %v280_v20 = vld [vmem:[%s2598_s1 + $0x540] sm:$0xff]  ;;  %405 = vmatpush.msra.mxu1 %v220_v19 }
  0x16   :  { %v152_v21 = vld [vmem:[%s2598_s1 + $0x140] sm:$0xff]  ;;  %429 = vmatpush.msra.mxu2 %v280_v20 }
  0x17   :  { %v344_v22 = vld [vmem:[%s2598_s1 + $0x740] sm:$0xff]  ;;  %383 = vmatpush.msra.mxu0 %v152_v21 }
  0x18   :  { %v216_v23 = vld [vmem:[%s2598_s1 + $0x340] sm:$0xff]  ;;  %452 = vmatpush.msra.mxu3 %v344_v22 }
  0x19   :  { %v276_v24 = vld [vmem:[%s2598_s1 + $0x520] sm:$0xff]  ;;  %406 = vmatpush.msra.mxu1 %v216_v23 }
  0x1a   :  { %v148_v25 = vld [vmem:[%s2598_s1 + $0x120] sm:$0xff]  ;;  %430 = vmatpush.msra.mxu2 %v276_v24 }
  0x1b   :  { %v340_v26 = vld [vmem:[%s2598_s1 + $0x720] sm:$0xff]  ;;  %384 = vmatpush.msra.mxu0 %v148_v25 }
  0x1c   :  { %v212_v27 = vld [vmem:[%s2598_s1 + $0x320] sm:$0xff]  ;;  %453 = vmatpush.msra.mxu3 %v340_v26 }
  0x1d   :  { %v272_v28 = vld [vmem:[%s2598_s1 + $0x500] sm:$0xff]  ;;  %407 = vmatpush.msra.mxu1 %v212_v27 }
  0x1e   :  { %v144_v29 = vld [vmem:[%s2598_s1 + $0x100] sm:$0xff]  ;;  %431 = vmatpush.msra.mxu2 %v272_v28 }
  0x1f   :  { %v336_v30 = vld [vmem:[%s2598_s1 + $0x700] sm:$0xff]  ;;  %385 = vmatpush.msra.mxu0 %v144_v29 }
  0x20   :  { %v208_v31 = vld [vmem:[%s2598_s1 + $0x300] sm:$0xff]  ;;  %454 = vmatpush.msra.mxu3 %v336_v30 }
  0x21   :  { %v268_v32 = vld [vmem:[%s2598_s1 + $0x4e0] sm:$0xff]  ;;  %408 = vmatpush.msra.mxu1 %v208_v31 }
  0x22   :  { %v140_v33 = vld [vmem:[%s2598_s1 + $0xe0] sm:$0xff]  ;;  %432 = vmatpush.msra.mxu2 %v268_v32 }
  0x23   :  { %v332_v34 = vld [vmem:[%s2598_s1 + $0x6e0] sm:$0xff]  ;;  %386 = vmatpush.msra.mxu0 %v140_v33 }
  0x24   :  { %v204_v35 = vld [vmem:[%s2598_s1 + $0x2e0] sm:$0xff]  ;;  %455 = vmatpush.msra.mxu3 %v332_v34 }
  0x25   :  { %v264_v36 = vld [vmem:[%s2598_s1 + $0x4c0] sm:$0xff]  ;;  %409 = vmatpush.msra.mxu1 %v204_v35 }
  0x26   :  { %v136_v37 = vld [vmem:[%s2598_s1 + $0xc0] sm:$0xff]  ;;  %433 = vmatpush.msra.mxu2 %v264_v36 }
  0x27   :  { %v328_v38 = vld [vmem:[%s2598_s1 + $0x6c0] sm:$0xff]  ;;  %387 = vmatpush.msra.mxu0 %v136_v37 }
  0x28   :  { %v200_v39 = vld [vmem:[%s2598_s1 + $0x2c0] sm:$0xff]  ;;  %456 = vmatpush.msra.mxu3 %v328_v38 }
  0x29   :  { %v260_v40 = vld [vmem:[%s2598_s1 + $0x4a0] sm:$0xff]  ;;  %410 = vmatpush.msra.mxu1 %v200_v39 }
  0x2a   :  { %v132_v41 = vld [vmem:[%s2598_s1 + $0xa0] sm:$0xff]  ;;  %434 = vmatpush.msra.mxu2 %v260_v40 }
  0x2b   :  { %v324_v42 = vld [vmem:[%s2598_s1 + $0x6a0] sm:$0xff]  ;;  %388 = vmatpush.msra.mxu0 %v132_v41 }
  0x2c   :  { %v196_v43 = vld [vmem:[%s2598_s1 + $0x2a0] sm:$0xff]  ;;  %457 = vmatpush.msra.mxu3 %v324_v42 }
  0x2d   :  { %v256_v44 = vld [vmem:[%s2598_s1 + $0x480] sm:$0xff]  ;;  %411 = vmatpush.msra.mxu1 %v196_v43 }
  0x2e   :  { %v128_v45 = vld [vmem:[%s2598_s1 + $0x80] sm:$0xff]  ;;  %435 = vmatpush.msra.mxu2 %v256_v44 }
  0x2f   :  { %v320_v46 = vld [vmem:[%s2598_s1 + $0x680] sm:$0xff]  ;;  %389 = vmatpush.msra.mxu0 %v128_v45 }
  0x30   :  { %v192_v47 = vld [vmem:[%s2598_s1 + $0x280] sm:$0xff]  ;;  %458 = vmatpush.msra.mxu3 %v320_v46 }
  0x31   :  { %v252_v48 = vld [vmem:[%s2598_s1 + $0x460] sm:$0xff]  ;;  %412 = vmatpush.msra.mxu1 %v192_v47 }
  0x32   :  { %v124_v49 = vld [vmem:[%s2598_s1 + $0x60] sm:$0xff]  ;;  %436 = vmatpush.msra.mxu2 %v252_v48 }
  0x33   :  { %v316_v50 = vld [vmem:[%s2598_s1 + $0x660] sm:$0xff]  ;;  %390 = vmatpush.msra.mxu0 %v124_v49 }
  0x34   :  { %v188_v51 = vld [vmem:[%s2598_s1 + $0x260] sm:$0xff]  ;;  %459 = vmatpush.msra.mxu3 %v316_v50 }
  0x35   :  { %v248_v52 = vld [vmem:[%s2598_s1 + $0x440] sm:$0xff]  ;;  %413 = vmatpush.msra.mxu1 %v188_v51 }
  0x36   :  { %v120_v53 = vld [vmem:[%s2598_s1 + $0x40] sm:$0xff]  ;;  %437 = vmatpush.msra.mxu2 %v248_v52 }
  0x37   :  { %v312_v54 = vld [vmem:[%s2598_s1 + $0x640] sm:$0xff]  ;;  %391 = vmatpush.msra.mxu0 %v120_v53 }
  0x38   :  { %v184_v55 = vld [vmem:[%s2598_s1 + $0x240] sm:$0xff]  ;;  %460 = vmatpush.msra.mxu3 %v312_v54 }
  0x39   :  { %v244_v56 = vld [vmem:[%s2598_s1 + $0x420] sm:$0xff]  ;;  %414 = vmatpush.msra.mxu1 %v184_v55 }
  0x3a   :  { %v116_v57 = vld [vmem:[%s2598_s1 + $0x20] sm:$0xff]  ;;  %438 = vmatpush.msra.mxu2 %v244_v56 }
  0x3b   :  { %v308_v58 = vld [vmem:[%s2598_s1 + $0x620] sm:$0xff]  ;;  %392 = vmatpush.msra.mxu0 %v116_v57 }
  0x3c   :  { %v180_v59 = vld [vmem:[%s2598_s1 + $0x220] sm:$0xff]  ;;  %461 = vmatpush.msra.mxu3 %v308_v58 }
  0x3d   :  { %v240_v60 = vld [vmem:[%s2598_s1 + $0x400] sm:$0xff]  ;;  %415 = vmatpush.msra.mxu1 %v180_v59 }
  0x3e   :  { %v112_v62 = vld [vmem:[%s2598_s1] sm:$0xff]  ;;  %439 = vmatpush.msra.mxu2 %v240_v60 }
  0x3f   :  { %v304_v63 = vld [vmem:[%s2598_s1 + $0x600] sm:$0xff]  ;;  %393 = vmatpush.msra.mxu0 %v112_v62 }
  0x40   :  { %v176_v3 = vld [vmem:[%s2598_s1 + $0x200] sm:$0xff]  ;;  %516 = vmatpush.msrb.mxu2 %v301_v61  ;;  %462 = vmatpush.msra.mxu3 %v304_v63 }
  0x41   :  { %v1513_v9 = vld [vmem:[%s2597_s0] sm:$0xff]  ;;  %470 = vmatpush.msrb.mxu0 %v173_v0  ;;  %416 = vmatpush.msra.mxu1 %v176_v3 }
  0x42   :  { %539 = vmatpush.msrb.mxu3 %v365_v2  ;;  %42 = vst [vmem:[#allocation1] ss:$4 sm:$0xff] %v1513_v9  ;;  %517 = vmatpush.msrb.mxu2 %v297_v1 }
  0x43   :  { %471 = vmatpush.msrb.mxu0 %v169_v4  ;;  %493 = vmatpush.msrb.mxu1 %v237_v5 }
  0x44   :  { %16 = vsyncpa [#allocation3], 0  ;;  %518 = vmatpush.msrb.mxu2 %v293_v6  ;;  %540 = vmatpush.msrb.mxu3 %v361_v7  ;;  %v161_v14 = vld [vmem:[%s2598_s1 + $0x188] sm:$0xff]  ;;  %v59_v32 = vld.sshfl [vmem:[#allocation1 + $0x20] sm:$0xff pattern:$0x73625140] }
  0x45   :  { %v229_v15 = vld [vmem:[%s2598_s1 + $0x3a8] sm:$0xff]  ;;  %472 = vmatpush.msrb.mxu0 %v165_v8  ;;  %494 = vmatpush.msrb.mxu1 %v233_v11  ;;  %67 = vst [vmem:[#allocation1 + $0x22] ss:$4 sm:$0xff] %v1518_v10  ;;  %vm97_vm0 = vcmask 1041408   ;;  %vm102_vm1 = vcmask 1043456   ;;  %vm107_vm2 = vcmask 1045504  }
  0x46   :  { %v285_v16 = vld [vmem:[%s2598_s1 + $0x568] sm:$0xff]  ;;  %519 = vmatpush.msrb.mxu2 %v289_v12  ;;  %541 = vmatpush.msrb.mxu3 %v357_v13  ;;  %vm821_vm3 = vcmask 982016   ;;  %s1227_s30 = smov 64   ;;  %s1228_s14 = smov 32   ;;  %vm939_vm4 = vcmask 654336   ;;  %vm1001_vm5 = vcmask 130048  }
  0x47   :  { %v353_v17 = vld [vmem:[%s2598_s1 + $0x788] sm:$0xff]  ;;  %473 = vmatpush.msrb.mxu0 %v161_v14  ;;  %495 = vmatpush.msrb.mxu1 %v229_v15  ;;  %s1229_s17 = smov 112   ;;  %vm941_vm6 = vcmask 261120   ;;  %vm943_vm7 = vcmask 916480   ;;  %vm945_vm8 = vcmask 523264   ;;  %vm1141_vm9 = vcmask 687104  }
  0x48   :  { %v157_v18 = vld [vmem:[%s2598_s1 + $0x168] sm:$0xff]  ;;  %520 = vmatpush.msrb.mxu2 %v285_v16  ;;  %542 = vmatpush.msrb.mxu3 %v353_v17  ;;  %s1230_s12 = smov [#allocation2]  }
  0x49   :  { %v225_v19 = vld [vmem:[%s2598_s1 + $0x388] sm:$0xff]  ;;  %v1570_v27 = vld.sshfl [vmem:[#allocation1] sm:$0xff pattern:$0x73625140]  ;;  %474 = vmatpush.msrb.mxu0 %v157_v18  ;;  %s1174_s13 = sshll.u32 %s1230_s12, 4  ;;  %s1175_s13 = int_to_ptr.vmem [resolvable:$true] %s1174_s13 }
  0x4a   :  { %v281_v20 = vld [vmem:[%s2598_s1 + $0x548] sm:$0xff]  ;;  %496 = vmatpush.msrb.mxu1 %v225_v19  ;;  %v45_v29 = vld.sshfl [vmem:[#allocation1 + $0x10] sm:$0xff pattern:$0x73625140] }
  0x4b   :  { %v349_v21 = vld [vmem:[%s2598_s1 + $0x768] sm:$0xff]  ;;  %v46_v30 = vld.sshfl [vmem:[#allocation1 + $0x18] sm:$0xff pattern:$0x73625140]  ;;  %521 = vmatpush.msrb.mxu2 %v281_v20 }
  0x4c   :  { %v153_v22 = vld [vmem:[%s2598_s1 + $0x148] sm:$0xff]  ;;  %543 = vmatpush.msrb.mxu3 %v349_v21  ;;  %v70_v52 = vld.sshfl [vmem:[#allocation1 + $0x20] sm:$0xff pattern:$0x73625140]  ;;  %v101_v59 = vsel %vm97_vm0, %v46_v30, %v59_v32  ;;  %v238_v32 = vld [vmem:[%s2598_s1 + $0x3f0] sm:$0xff] }
  0x4d   :  { %v221_v23 = vld [vmem:[%s2598_s1 + $0x368] sm:$0xff]  ;;  %475 = vmatpush.msrb.mxu0 %v153_v22 }
  0x4e   :  { %v277_v24 = vld [vmem:[%s2598_s1 + $0x528] sm:$0xff]  ;;  %497 = vmatpush.msrb.mxu1 %v221_v23 }
  0x4f   :  { %v345_v25 = vld [vmem:[%s2598_s1 + $0x748] sm:$0xff]  ;;  %522 = vmatpush.msrb.mxu2 %v277_v24 }
  0x50   :  { %v149_v26 = vld [vmem:[%s2598_s1 + $0x128] sm:$0xff]  ;;  %544 = vmatpush.msrb.mxu3 %v345_v25 }
  0x51   :  { %v1572_v28 = vld.sshfl [vmem:[#allocation1 + $0x8] sm:$0xff pattern:$0x73625140]  ;;  %476 = vmatpush.msrb.mxu0 %v149_v26 }
  0x52   :  { %v217_v31 = vld [vmem:[%s2598_s1 + $0x348] sm:$0xff]  ;;  %53 = vst [vmem:[#allocation1 + $0x1] ss:$4 sm:$0xff] %v1513_v9 }
  0x53   :  { %v273_v33 = vld [vmem:[%s2598_s1 + $0x508] sm:$0xff]  ;;  %498 = vmatpush.msrb.mxu1 %v217_v31 }
  0x54   :  { %v341_v34 = vld [vmem:[%s2598_s1 + $0x728] sm:$0xff]  ;;  %523 = vmatpush.msrb.mxu2 %v273_v33  ;;  %v294_v33 = vld [vmem:[%s2598_s1 + $0x5b0] sm:$0xff] }
  0x55   :  { %v145_v35 = vld [vmem:[%s2598_s1 + $0x108] sm:$0xff]  ;;  %545 = vmatpush.msrb.mxu3 %v341_v34  ;;  %v362_v34 = vld [vmem:[%s2598_s1 + $0x7d0] sm:$0xff] }
  0x56   :  { %v213_v36 = vld [vmem:[%s2598_s1 + $0x328] sm:$0xff]  ;;  %477 = vmatpush.msrb.mxu0 %v145_v35 }
  0x57   :  { %v269_v37 = vld [vmem:[%s2598_s1 + $0x4e8] sm:$0xff]  ;;  %499 = vmatpush.msrb.mxu1 %v213_v36  ;;  %v174_v36 = vld [vmem:[%s2598_s1 + $0x1f0] sm:$0xff] }
  0x58   :  { %v337_v38 = vld [vmem:[%s2598_s1 + $0x708] sm:$0xff]  ;;  %524 = vmatpush.msrb.mxu2 %v269_v37  ;;  %v234_v37 = vld [vmem:[%s2598_s1 + $0x3d0] sm:$0xff] }
  0x59   :  { %v141_v39 = vld [vmem:[%s2598_s1 + $0xe8] sm:$0xff]  ;;  %546 = vmatpush.msrb.mxu3 %v337_v38  ;;  %v58_v49 = vld.sshfl [vmem:[#allocation1 + $0x18] sm:$0xff pattern:$0x73625140] }
  0x5a   :  { %v209_v40 = vld [vmem:[%s2598_s1 + $0x308] sm:$0xff]  ;;  %478 = vmatpush.msrb.mxu0 %v141_v39  ;;  %v57_v54 = vld.sshfl [vmem:[#allocation1 + $0x10] sm:$0xff pattern:$0x73625140]  ;;  %v100_v58 = vsel %vm97_vm0, %v45_v29, %v58_v49 }
  0x5b   :  { %v265_v41 = vld [vmem:[%s2598_s1 + $0x4c8] sm:$0xff]  ;;  %500 = vmatpush.msrb.mxu1 %v209_v40  ;;  %v105_v2 = vsel %vm102_vm1, %v100_v58, %v70_v52  ;;  %v99_v6 = vsel %vm97_vm0, %v1572_v28, %v57_v54  ;;  %v366_v29 = vld [vmem:[%s2598_s1 + $0x7f0] sm:$0xff] }
  0x5c   :  { %v333_v42 = vld [vmem:[%s2598_s1 + $0x6e8] sm:$0xff]  ;;  %525 = vmatpush.msrb.mxu2 %v265_v41  ;;  %v290_v39 = vld [vmem:[%s2598_s1 + $0x590] sm:$0xff] }
  0x5d   :  { %v137_v43 = vld [vmem:[%s2598_s1 + $0xc8] sm:$0xff]  ;;  %547 = vmatpush.msrb.mxu3 %v333_v42  ;;  %v358_v40 = vld [vmem:[%s2598_s1 + $0x7b0] sm:$0xff] }
  0x5e   :  { %v205_v44 = vld [vmem:[%s2598_s1 + $0x2e8] sm:$0xff]  ;;  %479 = vmatpush.msrb.mxu0 %v137_v43  ;;  %v170_v41 = vld [vmem:[%s2598_s1 + $0x1d0] sm:$0xff] }
  0x5f   :  { %v261_v45 = vld [vmem:[%s2598_s1 + $0x4a8] sm:$0xff]  ;;  %501 = vmatpush.msrb.mxu1 %v205_v44  ;;  %v286_v42 = vld [vmem:[%s2598_s1 + $0x570] sm:$0xff] }
  0x60   :  { %v329_v46 = vld [vmem:[%s2598_s1 + $0x6c8] sm:$0xff]  ;;  %526 = vmatpush.msrb.mxu2 %v261_v45  ;;  %v354_v43 = vld [vmem:[%s2598_s1 + $0x790] sm:$0xff] }
  0x61   :  { %v133_v47 = vld [vmem:[%s2598_s1 + $0xa8] sm:$0xff]  ;;  %548 = vmatpush.msrb.mxu3 %v329_v46  ;;  %v166_v44 = vld [vmem:[%s2598_s1 + $0x1b0] sm:$0xff] }
  0x62   :  { %v201_v48 = vld [vmem:[%s2598_s1 + $0x2c8] sm:$0xff]  ;;  %480 = vmatpush.msrb.mxu0 %v133_v47  ;;  %v226_v45 = vld [vmem:[%s2598_s1 + $0x390] sm:$0xff] }
  0x63   :  { %v1627_v50 = vld.sshfl [vmem:[#allocation1 + $0x8] sm:$0xff pattern:$0x73625140]  ;;  %502 = vmatpush.msrb.mxu1 %v201_v48  ;;  %v282_v46 = vld [vmem:[%s2598_s1 + $0x550] sm:$0xff] }
  0x64   :  { %v257_v51 = vld [vmem:[%s2598_s1 + $0x488] sm:$0xff]  ;;  %65 = vst [vmem:[#allocation1 + $0x2] ss:$4 sm:$0xff] %v1513_v9  ;;  %v98_v24 = vsel %vm97_vm0, %v1570_v27, %v1627_v50  ;;  %v298_v27 = vld [vmem:[%s2598_s1 + $0x5d0] sm:$0xff] }
  0x65   :  { %v71_v53 = vld.sshfl [vmem:[#allocation1 + $0x28] sm:$0xff pattern:$0x73625140]  ;;  %527 = vmatpush.msrb.mxu2 %v257_v51  ;;  %v350_v47 = vld [vmem:[%s2598_s1 + $0x770] sm:$0xff] }
  0x66   :  { %79 = vst [vmem:[#allocation1 + $0x23] ss:$4 sm:$0xff] %v1518_v10  ;;  %v325_v55 = vld [vmem:[%s2598_s1 + $0x6a8] sm:$0xff]  ;;  %v106_v3 = vsel %vm102_vm1, %v101_v59, %v71_v53  ;;  %v162_v48 = vld [vmem:[%s2598_s1 + $0x190] sm:$0xff] }
  0x67   :  { %v129_v56 = vld [vmem:[%s2598_s1 + $0x88] sm:$0xff]  ;;  %549 = vmatpush.msrb.mxu3 %v325_v55  ;;  %v158_v49 = vld [vmem:[%s2598_s1 + $0x170] sm:$0xff] }
  0x68   :  { %v197_v57 = vld [vmem:[%s2598_s1 + $0x2a8] sm:$0xff]  ;;  %481 = vmatpush.msrb.mxu0 %v129_v56  ;;  %v222_v50 = vld [vmem:[%s2598_s1 + $0x370] sm:$0xff] }
  0x69   :  { %v253_v60 = vld [vmem:[%s2598_s1 + $0x468] sm:$0xff]  ;;  %503 = vmatpush.msrb.mxu1 %v197_v57  ;;  %v278_v51 = vld [vmem:[%s2598_s1 + $0x530] sm:$0xff] }
  0x6a   :  { %v321_v61 = vld [vmem:[%s2598_s1 + $0x688] sm:$0xff]  ;;  %528 = vmatpush.msrb.mxu2 %v253_v60  ;;  %v154_v56 = vld [vmem:[%s2598_s1 + $0x150] sm:$0xff] }
  0x6b   :  { %v125_v62 = vld [vmem:[%s2598_s1 + $0x68] sm:$0xff]  ;;  %550 = vmatpush.msrb.mxu3 %v321_v61  ;;  %v68_v16 = vld.sshfl [vmem:[#allocation1 + $0x10] sm:$0xff pattern:$0x73625140] }
  0x6c   :  { %v193_v63 = vld [vmem:[%s2598_s1 + $0x288] sm:$0xff]  ;;  %482 = vmatpush.msrb.mxu0 %v125_v62  ;;  %v69_v17 = vld.sshfl [vmem:[#allocation1 + $0x18] sm:$0xff pattern:$0x73625140]  ;;  %v103_v31 = vsel %vm102_vm1, %v98_v24, %v68_v16  ;;  %v346_v57 = vld [vmem:[%s2598_s1 + $0x750] sm:$0xff] }
  0x6d   :  { %v249_v0 = vld [vmem:[%s2598_s1 + $0x448] sm:$0xff]  ;;  %504 = vmatpush.msrb.mxu1 %v193_v63  ;;  %v83_v13 = vld.sshfl [vmem:[#allocation1 + $0x30] sm:$0xff pattern:$0x73625140]  ;;  %77 = vst [vmem:[#allocation1 + $0x3] ss:$4 sm:$0xff] %v1513_v9  ;;  %v104_v20 = vsel %vm102_vm1, %v99_v6, %v69_v17 }
  0x6e   :  { %v317_v1 = vld [vmem:[%s2598_s1 + $0x668] sm:$0xff]  ;;  %529 = vmatpush.msrb.mxu2 %v249_v0  ;;  %v1689_v18 = vsel %vm107_vm2, %v106_v3, %v83_v13  ;;  %v81_v19 = vld.sshfl [vmem:[#allocation1 + $0x20] sm:$0xff pattern:$0x73625140]  ;;  %v302_v9 = vld [vmem:[%s2598_s1 + $0x5f0] sm:$0xff] }
  0x6f   :  { %v121_v4 = vld [vmem:[%s2598_s1 + $0x48] sm:$0xff]  ;;  %551 = vmatpush.msrb.mxu3 %v317_v1  ;;  %v1699_v22 = vsel %vm107_vm2, %v104_v20, %v81_v19  ;;  %v218_v58 = vld [vmem:[%s2598_s1 + $0x350] sm:$0xff] }
  0x70   :  { %v189_v5 = vld [vmem:[%s2598_s1 + $0x268] sm:$0xff]  ;;  %483 = vmatpush.msrb.mxu0 %v121_v4  ;;  %463 = vmatmul.f32.vlgmr.msra.gmra.mxu3 %v1689_v18  ;;  %v274_v59 = vld [vmem:[%s2598_s1 + $0x510] sm:$0xff] }
  0x71   :  { %v245_v7 = vld [vmem:[%s2598_s1 + $0x428] sm:$0xff]  ;;  %505 = vmatpush.msrb.mxu1 %v189_v5  ;;  %v150_v60 = vld [vmem:[%s2598_s1 + $0x130] sm:$0xff] }
  0x72   :  { %v313_v8 = vld [vmem:[%s2598_s1 + $0x648] sm:$0xff]  ;;  %530 = vmatpush.msrb.mxu2 %v245_v7  ;;  %417 = vmatmul.f32.vlgmr.msra.gmra.mxu1 %v1699_v22  ;;  %v342_v61 = vld [vmem:[%s2598_s1 + $0x730] sm:$0xff] }
  0x73   :  { %v117_v11 = vld [vmem:[%s2598_s1 + $0x28] sm:$0xff]  ;;  %552 = vmatpush.msrb.mxu3 %v313_v8  ;;  %v214_v62 = vld [vmem:[%s2598_s1 + $0x330] sm:$0xff] }
  0x74   :  { %v82_v12 = vld.sshfl [vmem:[#allocation1 + $0x28] sm:$0xff pattern:$0x73625140]  ;;  %484 = vmatpush.msrb.mxu0 %v117_v11  ;;  %v80_v35 = vld.sshfl [vmem:[#allocation1 + $0x18] sm:$0xff pattern:$0x73625140] }
  0x75   :  { %v185_v14 = vld [vmem:[%s2598_s1 + $0x248] sm:$0xff]  ;;  %v1686_v15 = vsel %vm107_vm2, %v105_v2, %v82_v12  ;;  %v1746_v38 = vsel %vm107_vm2, %v103_v31, %v80_v35  ;;  %88 = vst [vmem:[#allocation1] ss:$4 sm:$0xff] %v1518_v10  ;;  %v230_v10 = vld [vmem:[%s2598_s1 + $0x3b0] sm:$0xff]  ;;  %v303_v35 = vld [vmem:[%s2598_s1 + $0x5f8] sm:$0xff] }
  0x76   :  { %440 = vmatmul.f32.vlgmr.msra.gmra.mxu2 %v1686_v15  ;;  %v241_v21 = vld [vmem:[%s2598_s1 + $0x408] sm:$0xff]  ;;  %506 = vmatpush.msrb.mxu1 %v185_v14  ;;  %v270_v63 = vld [vmem:[%s2598_s1 + $0x4f0] sm:$0xff] }
  0x77   :  { %v309_v23 = vld [vmem:[%s2598_s1 + $0x628] sm:$0xff]  ;;  %531 = vmatpush.msrb.mxu2 %v241_v21  ;;  %394 = vmatmul.f32.vlgmr.msra.gmra.mxu0 %v1746_v38  ;;  %v146_v0 = vld [vmem:[%s2598_s1 + $0x110] sm:$0xff] }
  0x78   :  { %v113_v25 = vld [vmem:[%s2598_s1 + $0x8] sm:$0xff]  ;;  %553 = vmatpush.msrb.mxu3 %v309_v23  ;;  %v338_v1 = vld [vmem:[%s2598_s1 + $0x710] sm:$0xff] }
  0x79   :  { %v181_v26 = vld [vmem:[%s2598_s1 + $0x228] sm:$0xff]  ;;  %608 = vmatpush.msra.mxu2 %v302_v9  ;;  %485 = vmatpush.msrb.mxu0 %v113_v25  ;;  %v142_v2 = vld [vmem:[%s2598_s1 + $0xf0] sm:$0xff] }
  0x7a   :  { %v305_v28 = vld [vmem:[%s2598_s1 + $0x608] sm:$0xff]  ;;  %507 = vmatpush.msrb.mxu1 %v181_v26  ;;  %v210_v3 = vld [vmem:[%s2598_s1 + $0x310] sm:$0xff] }
  0x7b   :  { %v177_v30 = vld [vmem:[%s2598_s1 + $0x208] sm:$0xff]  ;;  %554 = vmatpush.msrb.mxu3 %v305_v28  ;;  %609 = vmatpush.msra.mxu2 %v298_v27  ;;  %v266_v4 = vld [vmem:[%s2598_s1 + $0x4d0] sm:$0xff] }
  0x7c   :  { %508 = vmatpush.msrb.mxu1 %v177_v30  ;;  %562 = vmatpush.msra.mxu0 %v174_v36  ;;  %v1792_v52 = vld.sshfl [vmem:[#allocation1 + $0x10] sm:$0xff pattern:$0x73625140]  ;;  %v1794_v53 = vld.sshfl [vmem:[#allocation1] sm:$0xff pattern:$0x73625140] }
  0x7d   :  { %631 = vmatpush.msra.mxu3 %v366_v29  ;;  %610 = vmatpush.msra.mxu2 %v294_v33  ;;  %v1797_v54 = vld.sshfl [vmem:[#allocation1 + $0x18] sm:$0xff pattern:$0x73625140]  ;;  %v1799_v55 = vld.sshfl [vmem:[#allocation1 + $0x8] sm:$0xff pattern:$0x73625140] }
  0x7e   :  { %585 = vmatpush.msra.mxu1 %v238_v32  ;;  %563 = vmatpush.msra.mxu0 %v170_v41  ;;  %v334_v5 = vld [vmem:[%s2598_s1 + $0x6f0] sm:$0xff]  ;;  %v367_v41 = vld [vmem:[%s2598_s1 + $0x7f8] sm:$0xff] }
  0x7f   :  { %632 = vmatpush.msra.mxu3 %v362_v34  ;;  %611 = vmatpush.msra.mxu2 %v290_v39  ;;  %v138_v6 = vld [vmem:[%s2598_s1 + $0xd0] sm:$0xff]  ;;  %v175_v39 = vld [vmem:[%s2598_s1 + $0x1f8] sm:$0xff] }
  0x80   :  { %586 = vmatpush.msra.mxu1 %v234_v37  ;;  %564 = vmatpush.msra.mxu0 %v166_v44  ;;  %v206_v7 = vld [vmem:[%s2598_s1 + $0x2f0] sm:$0xff]  ;;  %v239_v44 = vld [vmem:[%s2598_s1 + $0x3f8] sm:$0xff] }
  0x81   :  { %633 = vmatpush.msra.mxu3 %v358_v40  ;;  %612 = vmatpush.msra.mxu2 %v286_v42  ;;  %v262_v8 = vld [vmem:[%s2598_s1 + $0x4b0] sm:$0xff]  ;;  %v299_v40 = vld [vmem:[%s2598_s1 + $0x5d8] sm:$0xff] }
  0x82   :  { %587 = vmatpush.msra.mxu1 %v230_v10  ;;  %443 = vmatmul.f32.gmra.mxu2 %v1792_v52  ;;  %v330_v11 = vld [vmem:[%s2598_s1 + $0x6d0] sm:$0xff]  ;;  %v171_v42 = vld [vmem:[%s2598_s1 + $0x1d8] sm:$0xff] }
  0x83   :  { %634 = vmatpush.msra.mxu3 %v354_v43  ;;  %613 = vmatpush.msra.mxu2 %v282_v46  ;;  %v134_v12 = vld [vmem:[%s2598_s1 + $0xb0] sm:$0xff]  ;;  %v295_v43 = vld [vmem:[%s2598_s1 + $0x5b8] sm:$0xff] }
  0x84   :  { %588 = vmatpush.msra.mxu1 %v226_v45  ;;  %565 = vmatpush.msra.mxu0 %v162_v48  ;;  %v202_v13 = vld [vmem:[%s2598_s1 + $0x2d0] sm:$0xff]  ;;  %v363_v45 = vld [vmem:[%s2598_s1 + $0x7d8] sm:$0xff] }
  0x85   :  { %635 = vmatpush.msra.mxu3 %v350_v47  ;;  %397 = vmatmul.f32.gmra.mxu0 %v1794_v53  ;;  %v258_v14 = vld [vmem:[%s2598_s1 + $0x490] sm:$0xff]  ;;  %v167_v46 = vld [vmem:[%s2598_s1 + $0x1b8] sm:$0xff] }
  0x86   :  { %466 = vmatmul.f32.gmra.mxu3 %v1797_v54  ;;  %420 = vmatmul.f32.gmra.mxu1 %v1799_v55  ;;  %v326_v16 = vld [vmem:[%s2598_s1 + $0x6b0] sm:$0xff]  ;;  %v291_v47 = vld [vmem:[%s2598_s1 + $0x598] sm:$0xff] }
  0x87   :  { %566 = vmatpush.msra.mxu0 %v158_v49  ;;  %589 = vmatpush.msra.mxu1 %v222_v50  ;;  %v130_v17 = vld [vmem:[%s2598_s1 + $0x90] sm:$0xff]  ;;  %v235_v48 = vld [vmem:[%s2598_s1 + $0x3d8] sm:$0xff] }
  0x88   :  { %614 = vmatpush.msra.mxu2 %v278_v51  ;;  %636 = vmatpush.msra.mxu3 %v346_v57  ;;  %v198_v19 = vld [vmem:[%s2598_s1 + $0x2b0] sm:$0xff]  ;;  %v359_v49 = vld [vmem:[%s2598_s1 + $0x7b8] sm:$0xff] }
  0x89   :  { %567 = vmatpush.msra.mxu0 %v154_v56  ;;  %590 = vmatpush.msra.mxu1 %v218_v58  ;;  %v254_v20 = vld [vmem:[%s2598_s1 + $0x470] sm:$0xff]  ;;  %v163_v50 = vld [vmem:[%s2598_s1 + $0x198] sm:$0xff] }
  0x8a   :  { %615 = vmatpush.msra.mxu2 %v274_v59  ;;  %637 = vmatpush.msra.mxu3 %v342_v61  ;;  %v322_v21 = vld [vmem:[%s2598_s1 + $0x690] sm:$0xff]  ;;  %v231_v51 = vld [vmem:[%s2598_s1 + $0x3b8] sm:$0xff] }
  0x8b   :  { %568 = vmatpush.msra.mxu0 %v150_v60  ;;  %591 = vmatpush.msra.mxu1 %v214_v62  ;;  %v126_v23 = vld [vmem:[%s2598_s1 + $0x70] sm:$0xff]  ;;  %v287_v56 = vld [vmem:[%s2598_s1 + $0x578] sm:$0xff] }
  0x8c   :  { %616 = vmatpush.msra.mxu2 %v270_v63  ;;  %638 = vmatpush.msra.mxu3 %v338_v1  ;;  %v194_v9 = vld [vmem:[%s2598_s1 + $0x290] sm:$0xff]  ;;  %v355_v57 = vld [vmem:[%s2598_s1 + $0x798] sm:$0xff] }
  0x8d   :  { %532 = vmatmul.f32.vlgmr.msrb.gmra.mxu2 %v1686_v15  ;;  %569 = vmatpush.msra.mxu0 %v146_v0  ;;  %v250_v24 = vld [vmem:[%s2598_s1 + $0x450] sm:$0xff]  ;;  %v159_v58 = vld [vmem:[%s2598_s1 + $0x178] sm:$0xff] }
  0x8e   :  { %486 = vmatmul.f32.vlgmr.msrb.gmra.mxu0 %v1746_v38  ;;  %555 = vmatmul.f32.vlgmr.msrb.gmra.mxu3 %v1689_v18  ;;  %v318_v25 = vld [vmem:[%s2598_s1 + $0x670] sm:$0xff]  ;;  %v227_v59 = vld [vmem:[%s2598_s1 + $0x398] sm:$0xff] }
  0x8f   :  { %509 = vmatmul.f32.vlgmr.msrb.gmra.mxu1 %v1699_v22  ;;  %570 = vmatpush.msra.mxu0 %v142_v2  ;;  %v122_v26 = vld [vmem:[%s2598_s1 + $0x50] sm:$0xff]  ;;  %v283_v60 = vld [vmem:[%s2598_s1 + $0x558] sm:$0xff] }
  0x90   :  { %592 = vmatpush.msra.mxu1 %v210_v3  ;;  %617 = vmatpush.msra.mxu2 %v266_v4  ;;  %v190_v28 = vld [vmem:[%s2598_s1 + $0x270] sm:$0xff]  ;;  %v351_v61 = vld [vmem:[%s2598_s1 + $0x778] sm:$0xff] }
  0x91   :  { %639 = vmatpush.msra.mxu3 %v334_v5  ;;  %571 = vmatpush.msra.mxu0 %v138_v6  ;;  %v246_v27 = vld [vmem:[%s2598_s1 + $0x430] sm:$0xff]  ;;  %v155_v62 = vld [vmem:[%s2598_s1 + $0x158] sm:$0xff] }
  0x92   :  { %593 = vmatpush.msra.mxu1 %v206_v7  ;;  %618 = vmatpush.msra.mxu2 %v262_v8  ;;  %v314_v29 = vld [vmem:[%s2598_s1 + $0x650] sm:$0xff]  ;;  %v223_v63 = vld [vmem:[%s2598_s1 + $0x378] sm:$0xff] }
  0x93   :  { %640 = vmatpush.msra.mxu3 %v330_v11  ;;  %572 = vmatpush.msra.mxu0 %v134_v12  ;;  %v118_v30 = vld [vmem:[%s2598_s1 + $0x30] sm:$0xff]  ;;  %v279_v0 = vld [vmem:[%s2598_s1 + $0x538] sm:$0xff] }
  0x94   :  { %594 = vmatpush.msra.mxu1 %v202_v13  ;;  %619 = vmatpush.msra.mxu2 %v258_v14  ;;  %v186_v31 = vld [vmem:[%s2598_s1 + $0x250] sm:$0xff]  ;;  %v347_v1 = vld [vmem:[%s2598_s1 + $0x758] sm:$0xff] }
  0x95   :  { %641 = vmatpush.msra.mxu3 %v326_v16  ;;  %535 = vmatmul.f32.gmra.mxu2 %v1792_v52  ;;  %v242_v32 = vld [vmem:[%s2598_s1 + $0x410] sm:$0xff]  ;;  %v151_v2 = vld [vmem:[%s2598_s1 + $0x138] sm:$0xff] }
  0x96   :  { %573 = vmatpush.msra.mxu0 %v130_v17  ;;  %595 = vmatpush.msra.mxu1 %v198_v19  ;;  %v310_v33 = vld [vmem:[%s2598_s1 + $0x630] sm:$0xff]  ;;  %v219_v3 = vld [vmem:[%s2598_s1 + $0x358] sm:$0xff] }
  0x97   :  { %620 = vmatpush.msra.mxu2 %v254_v20  ;;  %642 = vmatpush.msra.mxu3 %v322_v21  ;;  %v114_v34 = vld [vmem:[%s2598_s1 + $0x10] sm:$0xff]  ;;  %v275_v4 = vld [vmem:[%s2598_s1 + $0x518] sm:$0xff] }
  0x98   :  { %489 = vmatmul.f32.gmra.mxu0 %v1794_v53  ;;  %558 = vmatmul.f32.gmra.mxu3 %v1797_v54  ;;  %v182_v36 = vld [vmem:[%s2598_s1 + $0x230] sm:$0xff]  ;;  %v343_v5 = vld [vmem:[%s2598_s1 + $0x738] sm:$0xff] }
  0x99   :  { %574 = vmatpush.msra.mxu0 %v126_v23  ;;  %596 = vmatpush.msra.mxu1 %v194_v9  ;;  %v306_v37 = vld [vmem:[%s2598_s1 + $0x610] sm:$0xff]  ;;  %v147_v6 = vld [vmem:[%s2598_s1 + $0x118] sm:$0xff] }
  0x9a   :  { %621 = vmatpush.msra.mxu2 %v250_v24  ;;  %643 = vmatpush.msra.mxu3 %v318_v25  ;;  %v178_v10 = vld [vmem:[%s2598_s1 + $0x210] sm:$0xff]  ;;  %v215_v7 = vld [vmem:[%s2598_s1 + $0x338] sm:$0xff] }
  0x9b   :  { %512 = vmatmul.f32.gmra.mxu1 %v1799_v55  ;;  %575 = vmatpush.msra.mxu0 %v122_v26  ;;  %v271_v8 = vld [vmem:[%s2598_s1 + $0x4f8] sm:$0xff] }
  0x9c   :  { %597 = vmatpush.msra.mxu1 %v190_v28  ;;  %622 = vmatpush.msra.mxu2 %v246_v27  ;;  %v339_v11 = vld [vmem:[%s2598_s1 + $0x718] sm:$0xff] }
  0x9d   :  { %644 = vmatpush.msra.mxu3 %v314_v29  ;;  %576 = vmatpush.msra.mxu0 %v118_v30  ;;  %v143_v12 = vld [vmem:[%s2598_s1 + $0xf8] sm:$0xff] }
  0x9e   :  { %598 = vmatpush.msra.mxu1 %v186_v31  ;;  %623 = vmatpush.msra.mxu2 %v242_v32  ;;  %v211_v13 = vld [vmem:[%s2598_s1 + $0x318] sm:$0xff] }
  0x9f   :  { %645 = vmatpush.msra.mxu3 %v310_v33  ;;  %624 = vmatmul.f32.vlgmr.msra.gmra.mxu2 %v1686_v15  ;;  %v267_v14 = vld [vmem:[%s2598_s1 + $0x4d8] sm:$0xff] }
  0xa0   :  { %577 = vmatpush.msra.mxu0 %v114_v34  ;;  %700 = vmatpush.msrb.mxu2 %v303_v35  ;;  %v335_v16 = vld [vmem:[%s2598_s1 + $0x6f8] sm:$0xff] }
  0xa1   :  { %599 = vmatpush.msra.mxu1 %v182_v36  ;;  %646 = vmatpush.msra.mxu3 %v306_v37  ;;  %v139_v17 = vld [vmem:[%s2598_s1 + $0xd8] sm:$0xff] }
  0xa2   :  { %578 = vmatmul.f32.vlgmr.msra.gmra.mxu0 %v1746_v38  ;;  %647 = vmatmul.f32.vlgmr.msra.gmra.mxu3 %v1689_v18  ;;  %v207_v19 = vld [vmem:[%s2598_s1 + $0x2f8] sm:$0xff] }
  0xa3   :  { %654 = vmatpush.msrb.mxu0 %v175_v39  ;;  %701 = vmatpush.msrb.mxu2 %v299_v40  ;;  %v263_v20 = vld [vmem:[%s2598_s1 + $0x4b8] sm:$0xff] }
  0xa4   :  { %723 = vmatpush.msrb.mxu3 %v367_v41  ;;  %600 = vmatpush.msra.mxu1 %v178_v10  ;;  %v331_v21 = vld [vmem:[%s2598_s1 + $0x6d8] sm:$0xff] }
  0xa5   :  { %655 = vmatpush.msrb.mxu0 %v171_v42  ;;  %601 = vmatmul.f32.vlgmr.msra.gmra.mxu1 %v1699_v22  ;;  %v135_v23 = vld [vmem:[%s2598_s1 + $0xb8] sm:$0xff] }
  0xa6   :  { %702 = vmatpush.msrb.mxu2 %v295_v43  ;;  %677 = vmatpush.msrb.mxu1 %v239_v44  ;;  %v203_v9 = vld [vmem:[%s2598_s1 + $0x2d8] sm:$0xff] }
  0xa7   :  { %724 = vmatpush.msrb.mxu3 %v363_v45  ;;  %656 = vmatpush.msrb.mxu0 %v167_v46  ;;  %v259_v24 = vld [vmem:[%s2598_s1 + $0x498] sm:$0xff] }
  0xa8   :  { %703 = vmatpush.msrb.mxu2 %v291_v47  ;;  %678 = vmatpush.msrb.mxu1 %v235_v48  ;;  %v327_v25 = vld [vmem:[%s2598_s1 + $0x6b8] sm:$0xff]  ;;  %v768_v47 = vld [vmem:[%s2600_s3 + $0x70] sm:$0xff]  ;;  %v767_v48 = vld [vmem:[%s2600_s3 + $0x68] sm:$0xff] }
  0xa9   :  { %725 = vmatpush.msrb.mxu3 %v359_v49  ;;  %627 = vmatmul.f32.gmra.mxu2 %v1792_v52  ;;  %v131_v26 = vld [vmem:[%s2598_s1 + $0x98] sm:$0xff]  ;;  %v763_v49 = vld [vmem:[%s2600_s3 + $0x48] sm:$0xff] }
  0xaa   :  { %657 = vmatpush.msrb.mxu0 %v163_v50  ;;  %679 = vmatpush.msrb.mxu1 %v231_v51  ;;  %v199_v28 = vld [vmem:[%s2598_s1 + $0x2b8] sm:$0xff]  ;;  %v780_v50 = vld [vmem:[%s2600_s3 + $0xd0] sm:$0xff]  ;;  %v762_v51 = vld [vmem:[%s2600_s3 + $0x40] sm:$0xff] }
  0xab   :  { %704 = vmatpush.msrb.mxu2 %v287_v56  ;;  %726 = vmatpush.msrb.mxu3 %v355_v57  ;;  %v255_v27 = vld [vmem:[%s2598_s1 + $0x478] sm:$0xff]  ;;  %v779_v56 = vld [vmem:[%s2600_s3 + $0xc8] sm:$0xff] }
  0xac   :  { %581 = vmatmul.f32.gmra.mxu0 %v1794_v53  ;;  %650 = vmatmul.f32.gmra.mxu3 %v1797_v54  ;;  %v323_v29 = vld [vmem:[%s2598_s1 + $0x698] sm:$0xff] }
  0xad   :  { %658 = vmatpush.msrb.mxu0 %v159_v58  ;;  %680 = vmatpush.msrb.mxu1 %v227_v59  ;;  %v127_v30 = vld [vmem:[%s2598_s1 + $0x78] sm:$0xff]  ;;  %v778_v58 = vld [vmem:[%s2600_s3 + $0xc0] sm:$0xff]  ;;  %v760_v59 = vld [vmem:[%s2600_s3 + $0x30] sm:$0xff] }
  0xae   :  { %705 = vmatpush.msrb.mxu2 %v283_v60  ;;  %727 = vmatpush.msrb.mxu3 %v351_v61  ;;  %v195_v31 = vld [vmem:[%s2598_s1 + $0x298] sm:$0xff]  ;;  %v759_v61 = vld [vmem:[%s2600_s3 + $0x28] sm:$0xff] }
  0xaf   :  { %604 = vmatmul.f32.gmra.mxu1 %v1799_v55  ;;  %659 = vmatpush.msrb.mxu0 %v155_v62  ;;  %v251_v32 = vld [vmem:[%s2598_s1 + $0x458] sm:$0xff]  ;;  %v776_v62 = vld [vmem:[%s2600_s3 + $0xb0] sm:$0xff] }
  0xb0   :  { %681 = vmatpush.msrb.mxu1 %v223_v63  ;;  %706 = vmatpush.msrb.mxu2 %v279_v0  ;;  %v319_v33 = vld [vmem:[%s2598_s1 + $0x678] sm:$0xff]  ;;  %v758_v63 = vld [vmem:[%s2600_s3 + $0x20] sm:$0xff]  ;;  %v775_v0 = vld [vmem:[%s2600_s3 + $0xa8] sm:$0xff] }
  0xb1   :  { %728 = vmatpush.msrb.mxu3 %v347_v1  ;;  %660 = vmatpush.msrb.mxu0 %v151_v2  ;;  %v123_v34 = vld [vmem:[%s2598_s1 + $0x58] sm:$0xff]  ;;  %v774_v2 = vld [vmem:[%s2600_s3 + $0xa0] sm:$0xff] }
  0xb2   :  { %682 = vmatpush.msrb.mxu1 %v219_v3  ;;  %707 = vmatpush.msrb.mxu2 %v275_v4  ;;  %v191_v35 = vld [vmem:[%s2598_s1 + $0x278] sm:$0xff]  ;;  %v756_v3 = vld [vmem:[%s2600_s3 + $0x10] sm:$0xff] }
  0xb3   :  { %729 = vmatpush.msrb.mxu3 %v343_v5  ;;  %661 = vmatpush.msrb.mxu0 %v147_v6  ;;  %v247_v36 = vld [vmem:[%s2598_s1 + $0x438] sm:$0xff]  ;;  %v755_v5 = vld [vmem:[%s2600_s3 + $0x8] sm:$0xff]  ;;  %v772_v6 = vld [vmem:[%s2600_s3 + $0x90] sm:$0xff] }
  0xb4   :  { %683 = vmatpush.msrb.mxu1 %v215_v7  ;;  %708 = vmatpush.msrb.mxu2 %v271_v8  ;;  %v315_v37 = vld [vmem:[%s2598_s1 + $0x658] sm:$0xff]  ;;  %v754_v7 = vld [vmem:[%s2600_s3] sm:$0xff]  ;;  %v771_v8 = vld [vmem:[%s2600_s3 + $0x88] sm:$0xff] }
  0xb5   :  { %730 = vmatpush.msrb.mxu3 %v339_v11  ;;  %662 = vmatpush.msrb.mxu0 %v143_v12  ;;  %v119_v39 = vld [vmem:[%s2598_s1 + $0x38] sm:$0xff]  ;;  %v2245_v12 = vld [vmem:[%s2599_s2] sm:$0xf] }
  0xb6   :  { %684 = vmatpush.msrb.mxu1 %v211_v13  ;;  %709 = vmatpush.msrb.mxu2 %v267_v14  ;;  %v187_v40 = vld [vmem:[%s2598_s1 + $0x258] sm:$0xff]  ;;  %v770_v13 = vld [vmem:[%s2600_s3 + $0x80] sm:$0xff]  ;;  %v800_v14 = vld [vmem:[%s2600_s3 + $0x170] sm:$0xff] }
  0xb7   :  { %731 = vmatpush.msrb.mxu3 %v335_v16  ;;  %663 = vmatpush.msrb.mxu0 %v139_v17  ;;  %v243_v41 = vld [vmem:[%s2598_s1 + $0x418] sm:$0xff]  ;;  %v799_v16 = vld [vmem:[%s2600_s3 + $0x168] sm:$0xff]  ;;  %v370_v17 = vperm.slane %v2245_v12, 0 }
  0xb8   :  { %685 = vmatpush.msrb.mxu1 %v207_v19  ;;  %710 = vmatpush.msrb.mxu2 %v263_v20  ;;  %v311_v10 = vld [vmem:[%s2598_s1 + $0x638] sm:$0xff]  ;;  %v798_v19 = vld [vmem:[%s2600_s3 + $0x160] sm:$0xff] }
  0xb9   :  { %732 = vmatpush.msrb.mxu3 %v331_v21  ;;  %664 = vmatpush.msrb.mxu0 %v135_v23  ;;  %v115_v42 = vld [vmem:[%s2598_s1 + $0x18] sm:$0xff] }
  0xba   :  { %686 = vmatpush.msrb.mxu1 %v203_v9  ;;  %711 = vmatpush.msrb.mxu2 %v259_v24  ;;  %v183_v43 = vld [vmem:[%s2598_s1 + $0x238] sm:$0xff]  ;;  %v796_v24 = vld [vmem:[%s2600_s3 + $0x150] sm:$0xff] }
  0xbb   :  { %733 = vmatpush.msrb.mxu3 %v327_v25  ;;  %665 = vmatpush.msrb.mxu0 %v131_v26  ;;  %v307_v44 = vld [vmem:[%s2598_s1 + $0x618] sm:$0xff] }
  0xbc   :  { %687 = vmatpush.msrb.mxu1 %v199_v28  ;;  %712 = vmatpush.msrb.mxu2 %v255_v27  ;;  %v179_v45 = vld [vmem:[%s2598_s1 + $0x218] sm:$0xff]  ;;  %v795_v28 = vld [vmem:[%s2600_s3 + $0x148] sm:$0xff]  ;;  %s1226_s1 = smov 80  }
  0xbd   :  { %734 = vmatpush.msrb.mxu3 %v323_v29  ;;  %666 = vmatpush.msrb.mxu0 %v127_v30  ;;  %v769_v46 = vld [vmem:[%s2600_s3 + $0x78] sm:$0xff]  ;;  %v794_v30 = vld [vmem:[%s2600_s3 + $0x140] sm:$0xff] }
  0xbe   :  { %688 = vmatpush.msrb.mxu1 %v195_v31  ;;  %713 = vmatpush.msrb.mxu2 %v251_v32  ;;  %v761_v57 = vld [vmem:[%s2600_s3 + $0x38] sm:$0xff] }
  0xbf   :  { %735 = vmatpush.msrb.mxu3 %v319_v33  ;;  %667 = vmatpush.msrb.mxu0 %v123_v34  ;;  %v777_v60 = vld [vmem:[%s2600_s3 + $0xb8] sm:$0xff] }
  0xc0   :  { %689 = vmatpush.msrb.mxu1 %v191_v35  ;;  %714 = vmatpush.msrb.mxu2 %v247_v36  ;;  %v757_v1 = vld [vmem:[%s2600_s3 + $0x18] sm:$0xff] }
  0xc1   :  { %736 = vmatpush.msrb.mxu3 %v315_v37  ;;  %668 = vmatpush.msrb.mxu0 %v119_v39  ;;  %v773_v4 = vld [vmem:[%s2600_s3 + $0x98] sm:$0xff]  ;;  %v792_v37 = vld [vmem:[%s2600_s3 + $0x130] sm:$0xff] }
  0xc2   :  { %690 = vmatpush.msrb.mxu1 %v187_v40  ;;  %715 = vmatpush.msrb.mxu2 %v243_v41  ;;  %v801_v11 = vld [vmem:[%s2600_s3 + $0x178] sm:$0xff]  ;;  %v791_v40 = vld [vmem:[%s2600_s3 + $0x128] sm:$0xff] }
  0xc3   :  { %737 = vmatpush.msrb.mxu3 %v311_v10  ;;  %716 = vmatmul.f32.vlgmr.msrb.gmra.mxu2 %v1686_v15  ;;  %v785_v15 = vld [vmem:[%s2600_s3 + $0xf8] sm:$0xff]  ;;  %v371_v10 = vperm.slane %v2245_v12, 1 }
  0xc4   :  { %669 = vmatpush.msrb.mxu0 %v115_v42  ;;  %691 = vmatpush.msrb.mxu1 %v183_v43  ;;  %v797_v21 = vld [vmem:[%s2600_s3 + $0x158] sm:$0xff]  ;;  %v790_v42 = vld [vmem:[%s2600_s3 + $0x120] sm:$0xff] }
  0xc5   :  { %738 = vmatpush.msrb.mxu3 %v307_v44  ;;  %670 = vmatmul.f32.vlgmr.msrb.gmra.mxu0 %v1746_v38  ;;  %v783_v38 = vld [vmem:[%s2600_s3 + $0xe8] sm:$0xff]  ;;  %v793_v32 = vld [vmem:[%s2600_s3 + $0x138] sm:$0xff] }
  0xc6   :  { %739 = vmatmul.f32.vlgmr.msrb.gmra.mxu3 %v1689_v18  ;;  %692 = vmatpush.msrb.mxu1 %v179_v45  ;;  %v784_v18 = vld [vmem:[%s2600_s3 + $0xf0] sm:$0xff]  ;;  %v789_v45 = vld [vmem:[%s2600_s3 + $0x118] sm:$0xff] }
  0xc7   :  { %828 = vmatpush.msra.mxu0 %v769_v46  ;;  %693 = vmatmul.f32.vlgmr.msrb.gmra.mxu1 %v1699_v22  ;;  %v766_v22 = vld [vmem:[%s2600_s3 + $0x60] sm:$0xff] }
  0xc8   :  { %851 = vmatpush.msra.mxu1 %v785_v15  ;;  %874 = vmatpush.msra.mxu2 %v801_v11 }
  0xc9   :  { %829 = vmatpush.msra.mxu0 %v768_v47 }
  0xca   :  { %852 = vmatpush.msra.mxu1 %v784_v18  ;;  %875 = vmatpush.msra.mxu2 %v800_v14  ;;  %v788_v18 = vld [vmem:[%s2600_s3 + $0x110] sm:$0xff] }
  0xcb   :  { %830 = vmatpush.msra.mxu0 %v767_v48  ;;  %719 = vmatmul.f32.gmra.mxu2 %v1792_v52  ;;  %v765_v52 = vld [vmem:[%s2600_s3 + $0x58] sm:$0xff]  ;;  %v808_v14 = vld [vmem:[%s2600_s3 + $0x1b0] sm:$0xff] }
  0xcc   :  { %853 = vmatpush.msra.mxu1 %v783_v38  ;;  %876 = vmatpush.msra.mxu2 %v799_v16 }
  0xcd   :  { %673 = vmatmul.f32.gmra.mxu0 %v1794_v53  ;;  %v782_v53 = vld [vmem:[%s2600_s3 + $0xe0] sm:$0xff] }
  0xce   :  { %742 = vmatmul.f32.gmra.mxu3 %v1797_v54  ;;  %831 = vmatpush.msra.mxu0 %v766_v22  ;;  %v764_v54 = vld [vmem:[%s2600_s3 + $0x50] sm:$0xff] }
  0xcf   :  { %696 = vmatmul.f32.gmra.mxu1 %v1799_v55  ;;  %v781_v55 = vld [vmem:[%s2600_s3 + $0xd8] sm:$0xff]  ;;  %877 = vmatpush.msra.mxu2 %v798_v19 }
  0xd0   :  { %832 = vmatpush.msra.mxu0 %v765_v52  ;;  %854 = vmatpush.msra.mxu1 %v782_v53  ;;  %v787_v52 = vld [vmem:[%s2600_s3 + $0x108] sm:$0xff]  ;;  %v816_v53 = vld [vmem:[%s2600_s3 + $0x1f0] sm:$0xff] }
  0xd1   :  { %878 = vmatpush.msra.mxu2 %v797_v21  ;;  %898 = vmatpush.msra.mxu3 %v816_v53  ;;  %v807_v21 = vld [vmem:[%s2600_s3 + $0x1a8] sm:$0xff] }
  0xd2   :  { %833 = vmatpush.msra.mxu0 %v764_v54  ;;  %855 = vmatpush.msra.mxu1 %v781_v55  ;;  %v786_v55 = vld [vmem:[%s2600_s3 + $0x100] sm:$0xff] }
  0xd3   :  { %879 = vmatpush.msra.mxu2 %v796_v24  ;;  %v806_v24 = vld [vmem:[%s2600_s3 + $0x1a0] sm:$0xff] }
  0xd4   :  { %834 = vmatpush.msra.mxu0 %v763_v49  ;;  %856 = vmatpush.msra.mxu1 %v780_v50 }
  0xd5   :  { %880 = vmatpush.msra.mxu2 %v795_v28 }
  0xd6   :  { %835 = vmatpush.msra.mxu0 %v762_v51  ;;  %857 = vmatpush.msra.mxu1 %v779_v56  ;;  %v815_v56 = vld [vmem:[%s2600_s3 + $0x1e8] sm:$0xff] }
  0xd7   :  { %881 = vmatpush.msra.mxu2 %v794_v30  ;;  %899 = vmatpush.msra.mxu3 %v815_v56  ;;  %v961_v56 = vld [vmem:[%s2602_s5 + $0x70] sm:$0xff] }
  0xd8   :  { %836 = vmatpush.msra.mxu0 %v761_v57  ;;  %858 = vmatpush.msra.mxu1 %v778_v58  ;;  %v814_v57 = vld [vmem:[%s2600_s3 + $0x1e0] sm:$0xff] }
  0xd9   :  { %882 = vmatpush.msra.mxu2 %v793_v32  ;;  %900 = vmatpush.msra.mxu3 %v814_v57  ;;  %v803_v32 = vld [vmem:[%s2600_s3 + $0x188] sm:$0xff] }
  0xda   :  { %837 = vmatpush.msra.mxu0 %v760_v59  ;;  %859 = vmatpush.msra.mxu1 %v777_v60  ;;  %v813_v60 = vld [vmem:[%s2600_s3 + $0x1d8] sm:$0xff] }
  0xdb   :  { %883 = vmatpush.msra.mxu2 %v792_v37  ;;  %901 = vmatpush.msra.mxu3 %v813_v60  ;;  %v994_v60 = vld [vmem:[%s2602_s5 + $0x178] sm:$0xff] }
  0xdc   :  { %838 = vmatpush.msra.mxu0 %v759_v61  ;;  %860 = vmatpush.msra.mxu1 %v776_v62  ;;  %v812_v62 = vld [vmem:[%s2600_s3 + $0x1d0] sm:$0xff] }
  0xdd   :  { %884 = vmatpush.msra.mxu2 %v791_v40  ;;  %902 = vmatpush.msra.mxu3 %v812_v62 }
  0xde   :  { %839 = vmatpush.msra.mxu0 %v758_v63  ;;  %861 = vmatpush.msra.mxu1 %v775_v0 }
  0xdf   :  { %885 = vmatpush.msra.mxu2 %v790_v42 }
  0xe0   :  { %840 = vmatpush.msra.mxu0 %v757_v1  ;;  %862 = vmatpush.msra.mxu1 %v774_v2  ;;  %v811_v2 = vld [vmem:[%s2600_s3 + $0x1c8] sm:$0xff] }
  0xe1   :  { %886 = vmatpush.msra.mxu2 %v789_v45  ;;  %903 = vmatpush.msra.mxu3 %v811_v2 }
  0xe2   :  { %841 = vmatpush.msra.mxu0 %v756_v3  ;;  %863 = vmatpush.msra.mxu1 %v773_v4  ;;  %v810_v4 = vld [vmem:[%s2600_s3 + $0x1c0] sm:$0xff] }
  0xe3   :  { %887 = vmatpush.msra.mxu2 %v788_v18  ;;  %904 = vmatpush.msra.mxu3 %v810_v4  ;;  %v992_v4 = vld [vmem:[%s2602_s5 + $0x168] sm:$0xff] }
  0xe4   :  { %842 = vmatpush.msra.mxu0 %v755_v5  ;;  %864 = vmatpush.msra.mxu1 %v772_v6  ;;  %v372_v6 = vperm.slane %v2245_v12, 2 }
  0xe5   :  { %888 = vmatpush.msra.mxu2 %v787_v52 }
  0xe6   :  { %843 = vmatpush.msra.mxu0 %v754_v7  ;;  %865 = vmatpush.msra.mxu1 %v771_v8  ;;  %v809_v8 = vld [vmem:[%s2600_s3 + $0x1b8] sm:$0xff] }
  0xe7   :  { %889 = vmatpush.msra.mxu2 %v786_v55  ;;  %905 = vmatpush.msra.mxu3 %v809_v8 }
  0xe8   :  { %866 = vmatpush.msra.mxu1 %v770_v13 }
  0xe9   :  { %906 = vmatpush.msra.mxu3 %v808_v14 }
  0xea   :  { %1044 = vmatpush.msrb.mxu1 %v994_v60  ;;  %v963_v60 = vld [vmem:[%s2602_s5 + $0x80] sm:$0xff] }
  0xeb   :  { %907 = vmatpush.msra.mxu3 %v807_v21  ;;  %v973_v21 = vld [vmem:[%s2602_s5 + $0xd0] sm:$0xff] }
  0xed   :  { %908 = vmatpush.msra.mxu3 %v806_v24 }
  0xef   :  { %v418_v20 = vpop.f32.mrf.mxu1 }
  0xf3   :  { %v464_v27 = vpop.f32.mrf.mxu3 }
  0xf4   :  { %v395_v23 = vpop.f32.mrf.mxu0 }
  0xf5   :  { %v396_v9 = vadd.f32 %v395_v23, %v370_v17 }
  0xf7   :  { %v419_v25 = vadd.f32 %v418_v20, %v396_v9 }
  0xf9   :  { %v441_v26 = vpop.f32.mrf.mxu2 }
  0xfa   :  { %v442_v29 = vadd.f32 %v441_v26, %v419_v25  ;;  %v805_v26 = vld [vmem:[%s2600_s3 + $0x198] sm:$0xff] }
  0xfb   :  { %909 = vmatpush.msra.mxu3 %v805_v26  ;;  %v955_v26 = vld [vmem:[%s2602_s5 + $0x40] sm:$0xff] }
  0xfc   :  { %v465_v31 = vadd.f32 %v464_v27, %v442_v29 }
  0xfe   :  { %v746_v34 = vmax.f32 %v465_v31, 0.0  ;;  %v804_v31 = vld [vmem:[%s2600_s3 + $0x190] sm:$0xff] }
  0xff   :  { %910 = vmatpush.msra.mxu3 %v804_v31  ;;  %v954_v31 = vld [vmem:[%s2602_s5 + $0x38] sm:$0xff] }
 0x100   :  { %844 = vmatmul.f32.vlgmr.msra.gmra.mxu0 %v746_v34 }
 0x101   :  { %911 = vmatpush.msra.mxu3 %v803_v32  ;;  %v971_v32 = vld [vmem:[%s2602_s5 + $0xc0] sm:$0xff] }
 0x102   :  { %v398_v33 = vpop.f32.mrf.mxu0 }
 0x103   :  { %v399_v35 = vadd.f32 %v398_v33, %v370_v17  ;;  %v421_v36 = vpop.f32.mrf.mxu1 }
 0x105   :  { %v422_v39 = vadd.f32 %v421_v36, %v399_v35  ;;  %v444_v41 = vpop.f32.mrf.mxu2  ;;  %v802_v35 = vld [vmem:[%s2600_s3 + $0x180] sm:$0xff] }
 0x106   :  { %912 = vmatpush.msra.mxu3 %v802_v35 }
 0x107   :  { %v445_v43 = vadd.f32 %v444_v41, %v422_v39  ;;  %v373_v41 = vperm.slane %v2245_v12, 3 }
 0x109   :  { %v467_v44 = vpop.f32.mrf.mxu3 }
 0x10a   :  { %v468_v46 = vadd.f32 %v467_v44, %v445_v43 }
 0x10b   :  { %v487_v47 = vpop.f32.mrf.mxu0 }
 0x10c   :  { %v488_v15 = vadd.f32 %v487_v47, %v371_v10  ;;  %v510_v48 = vpop.f32.mrf.mxu1  ;;  %v750_v22 = vmax.f32 %v468_v46, 0.0 }
 0x10e   :  { %v511_v38 = vadd.f32 %v510_v48, %v488_v15  ;;  %847 = vmatmul.f32.gmra.mxu0 %v750_v22 }
 0x110   :  { %v533_v54 = vpop.f32.mrf.mxu2 }
 0x111   :  { %v534_v49 = vadd.f32 %v533_v54, %v511_v38  ;;  %v556_v50 = vpop.f32.mrf.mxu3 }
 0x113   :  { %v557_v51 = vadd.f32 %v556_v50, %v534_v49  ;;  %v1196_v50 = vld [vmem:[%s2601_s4] ss:$0 sm:$0xff] }
 0x115   :  { %v747_v58 = vmax.f32 %v557_v51, 0.0  ;;  %v490_v59 = vpop.f32.mrf.mxu0  ;;  %v962_v51 = vld [vmem:[%s2602_s5 + $0x78] sm:$0xff] }
 0x116   :  { %v491_v61 = vadd.f32 %v490_v59, %v371_v10  ;;  %1004 = vmatpush.msrb.mxu3 %v962_v51  ;;  %v978_v59 = vld [vmem:[%s2602_s5 + $0xf8] sm:$0xff] }
 0x117   :  { %867 = vmatmul.f32.vlgmr.msra.gmra.mxu1 %v747_v58  ;;  %v960_v58 = vld [vmem:[%s2602_s5 + $0x68] sm:$0xff]  ;;  %1024 = vmatpush.msrb.mxu0 %v978_v59  ;;  %v982_v51 = vld [vmem:[%s2602_s5 + $0x118] sm:$0xff] }
 0x118   :  { %v513_v63 = vpop.f32.mrf.mxu1  ;;  %v536_v1 = vpop.f32.mrf.mxu2  ;;  %1005 = vmatpush.msrb.mxu3 %v961_v56  ;;  %v965_v56 = vld [vmem:[%s2602_s5 + $0x90] sm:$0xff]  ;;  %v980_v59 = vld [vmem:[%s2602_s5 + $0x108] sm:$0xff] }
 0x119   :  { %v514_v0 = vadd.f32 %v513_v63, %v491_v61  ;;  %v977_v61 = vld [vmem:[%s2602_s5 + $0xf0] sm:$0xff]  ;;  %v959_v63 = vld [vmem:[%s2602_s5 + $0x60] sm:$0xff] }
 0x11a   :  { %1006 = vmatpush.msrb.mxu3 %v960_v58  ;;  %1025 = vmatpush.msrb.mxu0 %v977_v61  ;;  %v964_v58 = vld [vmem:[%s2602_s5 + $0x88] sm:$0xff]  ;;  %v979_v61 = vld [vmem:[%s2602_s5 + $0x100] sm:$0xff] }
 0x11b   :  { %v537_v3 = vadd.f32 %v536_v1, %v514_v0  ;;  %v559_v5 = vpop.f32.mrf.mxu3  ;;  %v993_v0 = vld [vmem:[%s2602_s5 + $0x170] sm:$0xff]  ;;  %v976_v1 = vld [vmem:[%s2602_s5 + $0xe8] sm:$0xff] }
 0x11c   :  { %1045 = vmatpush.msrb.mxu1 %v993_v0  ;;  %1007 = vmatpush.msrb.mxu3 %v959_v63  ;;  %v1097_v63 = vld [vmem:[%s2604_s7 + $0x68] sm:$0xff]  ;;  %v1096_v0 = vld [vmem:[%s2604_s7 + $0x60] sm:$0xff] }
 0x11d   :  { %v560_v7 = vadd.f32 %v559_v5, %v537_v3  ;;  %v958_v5 = vld [vmem:[%s2602_s5 + $0x58] sm:$0xff]  ;;  %1026 = vmatpush.msrb.mxu0 %v976_v1 }
 0x11e   :  { %1046 = vmatpush.msrb.mxu1 %v992_v4  ;;  %1008 = vmatpush.msrb.mxu3 %v958_v5  ;;  %v1095_v1 = vld [vmem:[%s2604_s7 + $0x58] sm:$0xff]  ;;  %v1092_v4 = vld [vmem:[%s2604_s7 + $0x40] sm:$0xff] }
 0x11f   :  { %v751_v11 = vmax.f32 %v560_v7, 0.0  ;;  %v579_v13 = vpop.f32.mrf.mxu0  ;;  %v991_v7 = vld [vmem:[%s2602_s5 + $0x160] sm:$0xff] }
 0x120   :  { %v580_v16 = vadd.f32 %v579_v13, %v372_v6  ;;  %v974_v13 = vld [vmem:[%s2602_s5 + $0xd8] sm:$0xff]  ;;  %1047 = vmatpush.msrb.mxu1 %v991_v7 }
 0x121   :  { %870 = vmatmul.f32.gmra.mxu1 %v751_v11  ;;  %v957_v11 = vld [vmem:[%s2602_s5 + $0x50] sm:$0xff] }
 0x122   :  { %v602_v17 = vpop.f32.mrf.mxu1  ;;  %v625_v19 = vpop.f32.mrf.mxu2  ;;  %1009 = vmatpush.msrb.mxu3 %v957_v11 }
 0x123   :  { %v603_v20 = vadd.f32 %v602_v17, %v580_v16  ;;  %v990_v16 = vld [vmem:[%s2602_s5 + $0x158] sm:$0xff]  ;;  %v996_v17 = vld [vmem:[%s2602_s5 + $0x188] sm:$0xff] }
 0x124   :  { %1078 = vmatpush.msrb.mxu2 %v996_v17  ;;  %1048 = vmatpush.msrb.mxu1 %v990_v16  ;;  %v1091_v17 = vld [vmem:[%s2604_s7 + $0x38] sm:$0xff] }
 0x125   :  { %v626_v23 = vadd.f32 %v625_v19, %v603_v20  ;;  %v648_v9 = vpop.f32.mrf.mxu3  ;;  %v956_v20 = vld [vmem:[%s2602_s5 + $0x48] sm:$0xff] }
 0x126   :  { %1010 = vmatpush.msrb.mxu3 %v956_v20  ;;  %v1089_v20 = vld [vmem:[%s2604_s7 + $0x28] sm:$0xff] }
 0x127   :  { %v649_v25 = vadd.f32 %v648_v9, %v626_v23  ;;  %v989_v9 = vld [vmem:[%s2602_s5 + $0x150] sm:$0xff] }
 0x128   :  { %1049 = vmatpush.msrb.mxu1 %v989_v9  ;;  %1011 = vmatpush.msrb.mxu3 %v955_v26  ;;  %v1086_v9 = vld [vmem:[%s2604_s7 + $0x10] sm:$0xff]  ;;  %v1135_v26 = vld [vmem:[%s2606_s9 + $0x48] sm:$0xff] }
 0x129   :  { %v582_v28 = vpop.f32.mrf.mxu0  ;;  %v748_v27 = vmax.f32 %v649_v25, 0.0 }
 0x12a   :  { %v583_v29 = vadd.f32 %v582_v28, %v372_v6  ;;  %v975_v6 = vld [vmem:[%s2602_s5 + $0xe0] sm:$0xff]  ;;  %v972_v28 = vld [vmem:[%s2602_s5 + $0xc8] sm:$0xff]  ;;  %1012 = vmatpush.msrb.mxu3 %v954_v31 }
 0x12b   :  { %890 = vmatmul.f32.vlgmr.msra.gmra.mxu2 %v748_v27  ;;  %1027 = vmatpush.msrb.mxu0 %v975_v6  ;;  %v1131_v31 = vld [vmem:[%s2606_s9 + $0x28] sm:$0xff] }
 0x12c   :  { %v605_v30 = vpop.f32.mrf.mxu1  ;;  %v628_v34 = vpop.f32.mrf.mxu2 }
 0x12d   :  { %v606_v33 = vadd.f32 %v605_v30, %v583_v29  ;;  %1028 = vmatpush.msrb.mxu0 %v974_v13  ;;  %v988_v29 = vld [vmem:[%s2602_s5 + $0x148] sm:$0xff] }
 0x12e   :  { %1050 = vmatpush.msrb.mxu1 %v988_v29  ;;  %v1133_v29 = vld [vmem:[%s2606_s9 + $0x38] sm:$0xff] }
 0x12f   :  { %v629_v36 = vadd.f32 %v628_v34, %v606_v33  ;;  %v651_v37 = vpop.f32.mrf.mxu3  ;;  %1029 = vmatpush.msrb.mxu0 %v973_v21  ;;  %v987_v34 = vld [vmem:[%s2602_s5 + $0x140] sm:$0xff] }
 0x130   :  { %1051 = vmatpush.msrb.mxu1 %v987_v34  ;;  %v1088_v21 = vld [vmem:[%s2604_s7 + $0x20] sm:$0xff]  ;;  %v1128_v34 = vld [vmem:[%s2606_s9 + $0x10] sm:$0xff] }
 0x131   :  { %v652_v39 = vadd.f32 %v651_v37, %v629_v36  ;;  %1030 = vmatpush.msrb.mxu0 %v972_v28  ;;  %v953_v37 = vld [vmem:[%s2602_s5 + $0x30] sm:$0xff]  ;;  %v1084_v28 = vld [vmem:[%s2604_s7] sm:$0xff] }
 0x132   :  { %1013 = vmatpush.msrb.mxu3 %v953_v37 }
 0x133   :  { %v752_v40 = vmax.f32 %v652_v39, 0.0  ;;  %1031 = vmatpush.msrb.mxu0 %v971_v32  ;;  %v1130_v32 = vld [vmem:[%s2606_s9 + $0x20] sm:$0xff] }
 0x135   :  { %893 = vmatmul.f32.gmra.mxu2 %v752_v40  ;;  %v952_v40 = vld [vmem:[%s2602_s5 + $0x28] sm:$0xff] }
 0x136   :  { %1014 = vmatpush.msrb.mxu3 %v952_v40 }
 0x142   :  { %v671_v10 = vpop.f32.mrf.mxu0 }
 0x143   :  { %v672_v42 = vadd.f32 %v671_v10, %v373_v41 }
 0x144   :  { %v694_v43 = vpop.f32.mrf.mxu1 }
 0x145   :  { %v695_v44 = vadd.f32 %v694_v43, %v672_v42  ;;  %v951_v42 = vld [vmem:[%s2602_s5 + $0x20] sm:$0xff] }
 0x146   :  { %v717_v45 = vpop.f32.mrf.mxu2  ;;  %1015 = vmatpush.msrb.mxu3 %v951_v42 }
 0x147   :  { %v718_v46 = vadd.f32 %v717_v45, %v695_v44  ;;  %v950_v44 = vld [vmem:[%s2602_s5 + $0x18] sm:$0xff] }
 0x148   :  { %1016 = vmatpush.msrb.mxu3 %v950_v44  ;;  %v1127_v44 = vld [vmem:[%s2606_s9 + $0x8] sm:$0xff] }
 0x149   :  { %v740_v47 = vpop.f32.mrf.mxu3 }
 0x14a   :  { %v741_v15 = vadd.f32 %v740_v47, %v718_v46  ;;  %v674_v48 = vpop.f32.mrf.mxu0  ;;  %v949_v46 = vld [vmem:[%s2602_s5 + $0x10] sm:$0xff]  ;;  %v948_v47 = vld [vmem:[%s2602_s5 + $0x8] sm:$0xff] }
 0x14b   :  { %v675_v22 = vadd.f32 %v674_v48, %v373_v41  ;;  %1017 = vmatpush.msrb.mxu3 %v949_v46  ;;  %v947_v48 = vld [vmem:[%s2602_s5] sm:$0xff] }
 0x14c   :  { %v749_v18 = vmax.f32 %v741_v15, 0.0  ;;  %v697_v38 = vpop.f32.mrf.mxu1  ;;  %v1198_v46 = vld [vmem:[%s2605_s8] ss:$0 sm:$0xff] }
 0x14d   :  { %v698_v52 = vadd.f32 %v697_v38, %v675_v22  ;;  %1018 = vmatpush.msrb.mxu3 %v948_v47  ;;  %v986_v22 = vld [vmem:[%s2602_s5 + $0x138] sm:$0xff]  ;;  %v969_v38 = vld [vmem:[%s2602_s5 + $0xb0] sm:$0xff] }
 0x14e   :  { %1185 = vmatmul.msk.f32.vlgmr.msra.gmra.mxu3 %vm821_vm3, %v749_v18  ;;  %v720_v53 = vpop.f32.mrf.mxu2  ;;  %v970_v18 = vld [vmem:[%s2602_s5 + $0xb8] sm:$0xff]  ;;  %1052 = vmatpush.msrb.mxu1 %v986_v22 }
 0x14f   :  { %v721_v54 = vadd.f32 %v720_v53, %v698_v52  ;;  %1019 = vmatpush.msrb.mxu3 %v947_v48  ;;  %1032 = vmatpush.msrb.mxu0 %v970_v18  ;;  %v985_v52 = vld [vmem:[%s2602_s5 + $0x130] sm:$0xff]  ;;  %v968_v53 = vld [vmem:[%s2602_s5 + $0xa8] sm:$0xff]  ;;  %v1199_v48 = vld [vmem:[%s2607_s10] ss:$0 sm:$0xff] }
 0x150   :  { %1053 = vmatpush.msrb.mxu1 %v985_v52 }
 0x151   :  { %v743_v55 = vpop.f32.mrf.mxu3  ;;  %1033 = vmatpush.msrb.mxu0 %v969_v38 }
 0x152   :  { %v744_v12 = vadd.f32 %v743_v55, %v721_v54  ;;  %v995_v54 = vld [vmem:[%s2602_s5 + $0x180] sm:$0xff]  ;;  %v984_v55 = vld [vmem:[%s2602_s5 + $0x128] sm:$0xff] }
 0x153   :  { %1079 = vmatpush.msrb.mxu2 %v995_v54  ;;  %1034 = vmatpush.msrb.mxu0 %v968_v53 }
 0x154   :  { %v753_v49 = vmax.f32 %v744_v12, 0.0  ;;  %v967_v12 = vld [vmem:[%s2602_s5 + $0xa0] sm:$0xff]  ;;  %1054 = vmatpush.msrb.mxu1 %v984_v55 }
 0x155   :  { %1035 = vmatpush.msrb.mxu0 %v967_v12 }
 0x156   :  { %1186 = vmatmul.msk.f32.gmra.mxu3 %vm821_vm3, %v753_v49  ;;  %v983_v49 = vld [vmem:[%s2602_s5 + $0x120] sm:$0xff] }
 0x157   :  { %1055 = vmatpush.msrb.mxu1 %v983_v49 }
 0x159   :  { %1056 = vmatpush.msrb.mxu1 %v982_v51 }
 0x17d   :  { %v845_v57 = vpop.f32.mrf.mxu0 }
 0x17e   :  { %v846_v62 = vadd.f32 %v1196_v50, %v845_v57  ;;  %v981_v57 = vld [vmem:[%s2602_s5 + $0x110] sm:$0xff] }
 0x17f   :  { %1057 = vmatpush.msrb.mxu1 %v981_v57 }
 0x181   :  { %1058 = vmatpush.msrb.mxu1 %v980_v59 }
 0x183   :  { %1059 = vmatpush.msrb.mxu1 %v979_v61 }
 0x18b   :  { %v848_v14 = vpop.f32.mrf.mxu0 }
 0x18c   :  { %v849_v24 = vadd.f32 %v1196_v50, %v848_v14  ;;  %v966_v50 = vld [vmem:[%s2602_s5 + $0x98] sm:$0xff] }
 0x18d   :  { %1036 = vmatpush.msrb.mxu0 %v966_v50 }
 0x18f   :  { %1037 = vmatpush.msrb.mxu0 %v965_v56 }
 0x191   :  { %1038 = vmatpush.msrb.mxu0 %v964_v58 }
 0x193   :  { %1039 = vmatpush.msrb.mxu0 %v963_v60 }
 0x194   :  { %v868_v2 = vpop.f32.mrf.mxu1 }
 0x195   :  { %v869_v8 = vadd.f32 %v868_v2, %v846_v62  ;;  %v1098_v62 = vld [vmem:[%s2604_s7 + $0x70] sm:$0xff] }
 0x196   :  { %1107 = vmatpush.msra.mxu2 %v1098_v62  ;;  %v1094_v2 = vld [vmem:[%s2604_s7 + $0x50] sm:$0xff] }
 0x198   :  { %1108 = vmatpush.msra.mxu2 %v1097_v63 }
 0x19a   :  { %1109 = vmatpush.msra.mxu2 %v1096_v0 }
 0x19c   :  { %1110 = vmatpush.msra.mxu2 %v1095_v1 }
 0x19e   :  { %v871_v27 = vpop.f32.mrf.mxu1  ;;  %1111 = vmatpush.msra.mxu2 %v1094_v2 }
 0x19f   :  { %v872_v35 = vadd.f32 %v871_v27, %v849_v24  ;;  %v1085_v24 = vld [vmem:[%s2604_s7 + $0x8] sm:$0xff]  ;;  %v1134_v27 = vld [vmem:[%s2606_s9 + $0x40] sm:$0xff] }
 0x1ae   :  { %v891_v3 = vpop.f32.mrf.mxu2 }
 0x1af   :  { %v892_v19 = vadd.f32 %v891_v3, %v869_v8  ;;  %v1093_v3 = vld [vmem:[%s2604_s7 + $0x48] sm:$0xff] }
 0x1b0   :  { %1112 = vmatpush.msra.mxu2 %v1093_v3 }
 0x1b2   :  { %1113 = vmatpush.msra.mxu2 %v1092_v4 }
 0x1b4   :  { %1114 = vmatpush.msra.mxu2 %v1091_v17 }
 0x1b8   :  { %v894_v33 = vpop.f32.mrf.mxu2 }
 0x1b9   :  { %v895_v39 = vadd.f32 %v894_v33, %v872_v35  ;;  %v1129_v33 = vld [vmem:[%s2606_s9 + $0x18] sm:$0xff]  ;;  %v1197_v35 = vld [vmem:[%s2603_s6] ss:$0 sm:$0xff] }
 0x1d1   :  { %v914_v23 = vpop.f32.mrf.mxu3 }
 0x1d2   :  { %v915_v25 = vadd.f32 %v914_v23, %v892_v19  ;;  %v1090_v19 = vld [vmem:[%s2604_s7 + $0x30] sm:$0xff]  ;;  %v1087_v23 = vld [vmem:[%s2604_s7 + $0x18] sm:$0xff] }
 0x1d3   :  { %1115 = vmatpush.msra.mxu2 %v1090_v19 }
 0x1d4   :  { %v2418_v30 = vmax.f32 %v915_v25, 0.0  ;;  %v1136_v25 = vld [vmem:[%s2606_s9 + $0x50] sm:$0xf] }
 0x1d5   :  { %1116 = vmatpush.msra.mxu2 %v1089_v20  ;;  %1189 = vmatpush.msk.msra.mxu3 %vm102_vm1, %v1136_v25 }
 0x1d6   :  { %v923_v36 = vrot.slane %v2418_v30, 2  ;;  %v927_v45 = vrot.slane %v2418_v30, 4  ;;  %v931_v15 = vrot.slane %v2418_v30, 6 }
 0x1d7   :  { %1117 = vmatpush.msra.mxu2 %v1088_v21  ;;  %1154 = vmatpush.msra.mxu3 %v1135_v26 }
 0x1d8   :  { %924 = vrot.lane.b32.xlu0 %v923_v36, %s1226_s1 }
 0x1d9   :  { %v917_v41 = vpop.f32.mrf.mxu3  ;;  %1118 = vmatpush.msra.mxu2 %v1087_v23  ;;  %1155 = vmatpush.msra.mxu3 %v1134_v27 }
 0x1da   :  { %v918_v10 = vadd.f32 %v917_v41, %v895_v39 }
 0x1db   :  { %1119 = vmatpush.msra.mxu2 %v1086_v9  ;;  %1156 = vmatpush.msra.mxu3 %v1133_v29 }
 0x1dc   :  { %v921_v43 = vmax.f32 %v918_v10, 0.0 }
 0x1dd   :  { %1120 = vmatpush.msra.mxu2 %v1085_v24 }
 0x1de   :  { %936 = vrot.lane.b32.xlu1 %v921_v43, %s1227_s30 }
 0x1df   :  { %1121 = vmatpush.msra.mxu2 %v1084_v28 }
 0x1e0   :  { %928 = vrot.lane.b32.xlu0 %v927_v45, %s1228_s14  ;;  %v1126_v45 = vld [vmem:[%s2606_s9] sm:$0xff] }
 0x1e6   :  { %932 = vrot.lane.b32.xlu1 %v931_v15, %s1229_s17 }
 0x24a   :  { %v925_v5 = vpop.permute.xlu0 %924 }
 0x24b   :  { %v940_v6 = vsel %vm939_vm4, %v2418_v30, %v925_v5  ;;  %v1132_v30 = vld [vmem:[%s2606_s9 + $0x30] sm:$0xff]  ;;  %s1176_s9 = sshll.u32 %s2608_s11, 4  ;;  %s1177_s9 = int_to_ptr.hbm [resolvable:$true] %s1176_s9 }
 0x24c   :  { %1020 = vmatmul.f32.vlgmr.msrb.gmra.mxu3 %v940_v6 }
 0x24d   :  { %1157 = vmatpush.msra.mxu3 %v1132_v30 }
 0x24f   :  { %1158 = vmatpush.msra.mxu3 %v1131_v31 }
 0x250   :  { %v937_v7 = vpop.permute.xlu1 %936 }
 0x251   :  { %1187 = vmatmul.msk.f32.vlgmr.msrb.gmra.mxu2 %vm1001_vm5, %v937_v7  ;;  %1159 = vmatpush.msra.mxu3 %v1130_v32 }
 0x252   :  { %v929_v8 = vpop.permute.xlu0 %928 }
 0x253   :  { %v942_v11 = vsel %vm941_vm6, %v925_v5, %v929_v8  ;;  %1160 = vmatpush.msra.mxu3 %v1129_v33 }
 0x255   :  { %1161 = vmatpush.msra.mxu3 %v1128_v34 }
 0x257   :  { %1162 = vmatpush.msra.mxu3 %v1127_v44 }
 0x258   :  { %v933_v13 = vpop.permute.xlu1 %932 }
 0x259   :  { %v944_v14 = vsel %vm943_vm7, %v942_v11, %v933_v13  ;;  %v946_v16 = vsel %vm945_vm8, %v933_v13, %v937_v7  ;;  %1163 = vmatpush.msra.mxu3 %v1126_v45 }
 0x25a   :  { %1040 = vmatmul.f32.vlgmr.msrb.gmra.mxu0 %v944_v14  ;;  %1060 = vmatmul.f32.vlgmr.msrb.gmra.mxu1 %v946_v16 }
 0x2cf   :  { %v1021_v36 = vpop.f32.mrf.mxu3 }
 0x2d0   :  { %v1022_v37 = vadd.f32 %v1197_v35, %v1021_v36 }
 0x2d4   :  { %v1081_v42 = vpop.f32.mrf.mxu2 }
 0x2d7   :  { %v1041_v39 = vpop.f32.mrf.mxu0  ;;  %v1061_v41 = vpop.f32.mrf.mxu1 }
 0x2d8   :  { %v1042_v40 = vadd.f32 %v1041_v39, %v1022_v37 }
 0x2da   :  { %v1062_v10 = vadd.f32 %v1061_v41, %v1042_v40 }
 0x2dc   :  { %v1082_v43 = vadd.f32 %v1081_v42, %v1062_v10 }
 0x2de   :  { %1188 = vmatmul.msk.f32.vlgmr.msra.gmra.mxu2 %vm821_vm3, %v1082_v43 }
 0x361   :  { %v1123_v47 = vpop.f32.mrf.mxu2 }
 0x362   :  { %v1124_v15 = vadd.f32 %v1198_v46, %v1123_v47 }
 0x364   :  { %1190 = vmatmul.msk.f32.vlgmr.msra.gmra.mxu3 %vm1141_vm9, %v1124_v15 }
 0x3e7   :  { %v1165_v18 = vpop.f32.mrf.mxu3 }
 0x3e8   :  { %v1166_v22 = vadd.f32 %v1199_v48, %v1165_v18 }
 0x3ea   :  { %1168 = vst [vmem:[#allocation2] sm:$0x3] %v1166_v22 }
 0x3eb   :  { %1179 = dma.vmem_to_hbm [thread:$0]  %s1175_s13, 32, %s1177_s9, [#allocation3]  }
 0x3ec   :  { %1224 = dma.done.wait [#allocation3], 32  }
 0x3ed   :  { %1225 = vsyncadd [#allocation3], 4294967264 }
 0x3ee   :  { %1184 = vsyncpa [#allocation3], 1 }

</bundles_post_ra>
